<compile_context>
chip_gen: v6e
topology: v6e:2x2x1
jax: 0.10.0
libtpu: 0.0.40
codegen_flags: <defaults>
</compile_context>

<pallas_src>
import functools

import numpy as np
import jax
import jax.numpy as jnp
from jax.experimental import pallas as pl
from jax.experimental.pallas import tpu as pltpu


_TM_MAX = 8192                     # max lane-dim tile (multiple of 128)
_SINGLE_BLOCK_M = 1024             # below this, one full-array block (grid=(1,))
_VMEM_LIMIT = 32 * 1024 * 1024     # scoped-VMEM budget, safe on v5e/v6e/v7x (64MiB)


def _round_up(x, m):
    return ((x + m - 1) // m) * m


def _tile_m(M):
    # Small M: a single full-array block (always a legal block shape).
    # Large M: 128-aligned tile <= _TM_MAX, sized so the grid has >= 2 steps
    # (keeps both v7x TensorCores busy via the "parallel" dimension semantic).
    if M < _SINGLE_BLOCK_M:
        return M
    return min(_TM_MAX, _round_up(pl.cdiv(M, 2), 128))


def _mspec(shape, index_map, n_steps):
    # Activation tiles: deepen the pipeline when the grid is long enough that a
    # third buffer can actually hide DMA latency (per-tile compute is tiny).
    if n_steps >= 3:
        return pl.BlockSpec(shape, index_map, pipeline_mode=pl.Buffered(3))
    return pl.BlockSpec(shape, index_map)


def _compiler_params():
    return pltpu.CompilerParams(
        dimension_semantics=("parallel",),     # M tiles are independent
        vmem_limit_bytes=_VMEM_LIMIT,
    )


# ----------------------------- Pallas kernels ------------------------------ #

def _conv1x1_affine_kernel(x_ref, w_ref, scale_ref, shift_ref, o_ref, *, act, neg_slope):
    # (Cout, Cin) @ (Cin, TM) on the MXU in bf16, f32 accumulate/epilogue.
    y = jnp.dot(w_ref[...].astype(jnp.bfloat16),
                x_ref[...].astype(jnp.bfloat16),
                preferred_element_type=jnp.float32)
    y = y * scale_ref[...] + shift_ref[...]          # folded BN (or bias), f32
    if act == "relu":
        y = jnp.maximum(y, 0.0)
    elif act == "leaky":
        y = jnp.where(y >= 0.0, y, neg_slope * y)
    o_ref[...] = y.astype(o_ref.dtype)


def _conv1x1_residual_kernel(x_ref, r_ref, w_ref, o_ref, *, act, neg_slope):
    # (x + residual) in f32, then bf16 matmul, f32 epilogue.
    s = (x_ref[...].astype(jnp.float32) + r_ref[...].astype(jnp.float32)).astype(jnp.bfloat16)
    y = jnp.dot(w_ref[...].astype(jnp.bfloat16), s, preferred_element_type=jnp.float32)
    if act == "relu":
        y = jnp.maximum(y, 0.0)
    elif act == "leaky":
        y = jnp.where(y >= 0.0, y, neg_slope * y)
    o_ref[...] = y.astype(o_ref.dtype)


def _conv1x1_residual_final_kernel(x_ref, r_ref, w_ref, wf_ref, bf_ref, o_ref, *, neg_slope):
    # Last layer: conv2 on (x1+y) -> LeakyReLU -> final Cout=1 1x1 conv + bias,
    # all fused so the (Cout, M) activation never leaves VMEM.
    s = (x_ref[...].astype(jnp.float32) + r_ref[...].astype(jnp.float32)).astype(jnp.bfloat16)
    y = jnp.dot(w_ref[...].astype(jnp.bfloat16), s, preferred_element_type=jnp.float32)
    y = jnp.where(y >= 0.0, y, neg_slope * y)
    z = jnp.dot(wf_ref[...].astype(jnp.bfloat16), y.astype(jnp.bfloat16),
                preferred_element_type=jnp.float32)
    o_ref[...] = (z + bf_ref[...]).astype(o_ref.dtype)


def _fourier_unit_kernel(s_ref, w_ref, scale_ref, shift_ref, or_ref, oi_ref):
    # Fused [real ; imag] stacked input -> single K=2c 1x1 conv -> BN -> ReLU
    # -> split back into real/imag outputs.
    y = jnp.dot(w_ref[...].astype(jnp.bfloat16), s_ref[...].astype(jnp.bfloat16),
                preferred_element_type=jnp.float32)
    y = y * scale_ref[...] + shift_ref[...]
    y = jnp.maximum(y, 0.0)
    c = or_ref.shape[0]
    or_ref[...] = y[:c].astype(or_ref.dtype)
    oi_ref[...] = y[c:].astype(oi_ref.dtype)


# ------------------------------ kernel wrappers ----------------------------- #

def conv1x1_affine(x2d, w, scale, shift, *, act=None, neg_slope=0.2,
                   out_dtype=jnp.float32):
    """x2d: (Cin, M); w: (Cout, Cin); scale/shift: (Cout,).  Returns (Cout, M)."""
    Cin, M = x2d.shape
    Cout = w.shape[0]
    TM = _tile_m(M)
    n_steps = pl.cdiv(M, TM)
    scale2 = jnp.asarray(scale, jnp.float32).reshape(Cout, 1)
    shift2 = jnp.asarray(shift, jnp.float32).reshape(Cout, 1)
    cost = pl.CostEstimate(
        flops=2 * M * Cin * Cout,
        transcendentals=0,
        bytes_accessed=(M * Cin * x2d.dtype.itemsize + Cout * Cin * w.dtype.itemsize
                        + 2 * Cout * 4 + M * Cout * jnp.dtype(out_dtype).itemsize),
    )
    kern = functools.partial(_conv1x1_affine_kernel, act=act, neg_slope=neg_slope)
    return pl.pallas_call(
        kern,
        out_shape=jax.ShapeDtypeStruct((Cout, M), out_dtype),
        grid=(n_steps,),
        in_specs=[
            _mspec((Cin, TM), lambda i: (0, i), n_steps),
            pl.BlockSpec((Cout, Cin), lambda i: (0, 0)),   # weight stays resident
            pl.BlockSpec((Cout, 1), lambda i: (0, 0)),
            pl.BlockSpec((Cout, 1), lambda i: (0, 0)),
        ],
        out_specs=pl.BlockSpec((Cout, TM), lambda i: (0, i)),
        compiler_params=_compiler_params(),
        cost_estimate=cost,
    )(x2d, w, scale2, shift2)


def conv1x1_residual(x2d, r2d, w, *, act=None, neg_slope=0.2, out_dtype=jnp.float32):
    """(x2d + r2d) @ w^T with activation.  x2d/r2d: (Cin, M); w: (Cout, Cin)."""
    Cin, M = x2d.shape
    Cout = w.shape[0]
    TM = _tile_m(M)
    n_steps = pl.cdiv(M, TM)
    cost = pl.CostEstimate(
        flops=2 * M * Cin * Cout + M * Cin,
        transcendentals=0,
        bytes_accessed=(M * Cin * (x2d.dtype.itemsize + r2d.dtype.itemsize)
                        + Cout * Cin * w.dtype.itemsize
                        + M * Cout * jnp.dtype(out_dtype).itemsize),
    )
    kern = functools.partial(_conv1x1_residual_kernel, act=act, neg_slope=neg_slope)
    return pl.pallas_call(
        kern,
        out_shape=jax.ShapeDtypeStruct((Cout, M), out_dtype),
        grid=(n_steps,),
        in_specs=[
            _mspec((Cin, TM), lambda i: (0, i), n_steps),
            _mspec((Cin, TM), lambda i: (0, i), n_steps),
            pl.BlockSpec((Cout, Cin), lambda i: (0, 0)),
        ],
        out_specs=pl.BlockSpec((Cout, TM), lambda i: (0, i)),
        compiler_params=_compiler_params(),
        cost_estimate=cost,
    )(x2d, r2d, w)


def conv1x1_residual_final(x2d, r2d, w, wf, bf, *, neg_slope=0.2):
    """Fused last stage: leaky(conv2(x2d + r2d)) -> final 1x1 conv (Cout=1) + bias.

    x2d/r2d: (Cin, M); w: (Cout, Cin); wf: (1, Cout); bf: (1,).  Returns (1, M) f32."""
    Cin, M = x2d.shape
    Cout = w.shape[0]
    TM = _tile_m(M)
    n_steps = pl.cdiv(M, TM)
    bf2 = jnp.asarray(bf, jnp.float32).reshape(1, 1)
    cost = pl.CostEstimate(
        flops=2 * M * Cin * Cout + 2 * M * Cout + M * Cin,
        transcendentals=0,
        bytes_accessed=(M * Cin * (x2d.dtype.itemsize + r2d.dtype.itemsize)
                        + Cout * Cin * w.dtype.itemsize + Cout * wf.dtype.itemsize
                        + 4 + M * 4),
    )
    kern = functools.partial(_conv1x1_residual_final_kernel, neg_slope=neg_slope)
    return pl.pallas_call(
        kern,
        out_shape=jax.ShapeDtypeStruct((1, M), jnp.float32),
        grid=(n_steps,),
        in_specs=[
            _mspec((Cin, TM), lambda i: (0, i), n_steps),
            _mspec((Cin, TM), lambda i: (0, i), n_steps),
            pl.BlockSpec((Cout, Cin), lambda i: (0, 0)),
            pl.BlockSpec((1, Cout), lambda i: (0, 0)),
            pl.BlockSpec((1, 1), lambda i: (0, 0)),
        ],
        out_specs=pl.BlockSpec((1, TM), lambda i: (0, i)),
        compiler_params=_compiler_params(),
        cost_estimate=cost,
    )(x2d, r2d, w, wf, bf2)


def fourier_unit_conv(spec2d, w, scale, shift):
    """spec2d: (2c, Mf) = [real ; imag] stacked (bf16); w: (2c, 2c).

    Returns (real, imag), each (c, Mf) f32."""
    c2, M0 = spec2d.shape
    c = c2 // 2
    # Lane-pad Mf (almost never a multiple of 128) so stores are unmasked; the
    # pad fuses into the XLA op that materializes spec2d anyway.
    M = _round_up(M0, 128)
    if M != M0:
        spec2d = jnp.pad(spec2d, ((0, 0), (0, M - M0)))
    TM = _tile_m(M)
    n_steps = pl.cdiv(M, TM)
    scale2 = jnp.asarray(scale, jnp.float32).reshape(c2, 1)
    shift2 = jnp.asarray(shift, jnp.float32).reshape(c2, 1)
    cost = pl.CostEstimate(
        flops=2 * M * c2 * c2,
        transcendentals=0,
        bytes_accessed=(M * c2 * spec2d.dtype.itemsize + c2 * c2 * w.dtype.itemsize
                        + 2 * c2 * 4 + 2 * M * c * 4),
    )
    out_re, out_im = pl.pallas_call(
        _fourier_unit_kernel,
        out_shape=(jax.ShapeDtypeStruct((c, M), jnp.float32),
                   jax.ShapeDtypeStruct((c, M), jnp.float32)),
        grid=(n_steps,),
        in_specs=[
            _mspec((c2, TM), lambda i: (0, i), n_steps),
            pl.BlockSpec((c2, c2), lambda i: (0, 0)),
            pl.BlockSpec((c2, 1), lambda i: (0, 0)),
            pl.BlockSpec((c2, 1), lambda i: (0, 0)),
        ],
        out_specs=(pl.BlockSpec((c, TM), lambda i: (0, i)),
                   pl.BlockSpec((c, TM), lambda i: (0, i))),
        compiler_params=_compiler_params(),
        cost_estimate=cost,
    )(spec2d, w, scale2, shift2)
    if M != M0:
        out_re = out_re[:, :M0]
        out_im = out_im[:, :M0]
    return out_re, out_im


# ------------------------------ model forward ------------------------------ #

def _avg_pool2x2_cnhw(x):  # x: (C, N, H, W), even H/W; mean accumulated in f32
    C, N, H, W = x.shape
    p = x.astype(jnp.float32).reshape(C, N, H // 2, 2, W // 2, 2).mean(axis=(3, 5))
    return p.astype(x.dtype)


def spectral_transform_forward(x, p, *, stride, out_dtype, final_w=None, final_b=None,
                               neg_slope=0.2):
    """SpectralTransform forward (== FastFourierConvolution with alpha=1) + LeakyReLU.

    x: (Cin, N, H, W).  Returns (Cout, N, H', W'); if final_w is given, the final
    Cout=1 1x1 conv (+bias) of the discriminator is fused in and (1, N, H', W')
    is returned instead."""
    if stride == 2:
        x = _avg_pool2x2_cnhw(x)
    C, N, H, W = x.shape
    c_half = p["conv1_w"].shape[0]
    c_out = p["conv2_w"].shape[0]
    M = N * H * W

    # conv1: 1x1 conv (bias=False) + BN + ReLU; kept f32 (feeds the FFT).
    x1 = conv1x1_affine(x.reshape(C, M), p["conv1_w"],
                        p["conv1_scale"], p["conv1_shift"],
                        act="relu", out_dtype=jnp.float32)
    x1_4d = x1.reshape(c_half, N, H, W)

    # FourierUnit: rfft2(ortho) -> [real ; imag] 1x1 conv + BN + ReLU -> irfft2(ortho).
    Xf = jnp.fft.rfftn(x1_4d, axes=(-2, -1), norm="ortho")     # (c_half, N, H, Wf) complex64
    Wf = Xf.shape[-1]
    Mf = N * H * Wf
    # Block concat along channels (matches torch.cat([x.real, x.imag], dim=1)),
    # cast to bf16 in the same fusion as the extraction -> halves input DMA bytes.
    spec = jnp.concatenate([jnp.real(Xf), jnp.imag(Xf)], axis=0).astype(jnp.bfloat16)
    spec = spec.reshape(2 * c_half, Mf)
    out_re, out_im = fourier_unit_conv(spec, p["fu_w"], p["fu_scale"], p["fu_shift"])
    Xc = jax.lax.complex(out_re.reshape(c_half, N, H, Wf),
                         out_im.reshape(c_half, N, H, Wf))
    y = jnp.fft.irfftn(Xc, s=(H, W), axes=(-2, -1), norm="ortho")  # (c_half, N, H, W) f32

    if final_w is None:
        # conv2: 1x1 conv (bias=False) on (x1 + y); discriminator's LeakyReLU fused.
        out = conv1x1_residual(x1, y.reshape(c_half, M), p["conv2_w"],
                               act="leaky", neg_slope=neg_slope, out_dtype=out_dtype)
        return out.reshape(c_out, N, H, W)

    # Last layer: conv2 + LeakyReLU + final Cout=1 conv (+bias) in one kernel.
    out = conv1x1_residual_final(x1, y.reshape(c_half, M), p["conv2_w"],
                                 final_w, final_b, neg_slope=neg_slope)
    return out.reshape(1, N, H, W)


def no_norm_discriminator_forward(x_nchw, params):
    # NCHW -> CNHW: channels lead, (N,H,W) flattens onto the lane axis.
    h = jnp.transpose(x_nchw, (1, 0, 2, 3))
    layers = params["ffc_layers"]
    n_layers = len(layers)
    for idx, (p, stride) in enumerate(layers):
        if idx < n_layers - 1:
            # Intermediate activations written back as bf16 to halve HBM traffic.
            h = spectral_transform_forward(h, p, stride=stride, out_dtype=jnp.bfloat16)
        else:
            # Final nn.Conv2d(ndf*4, 1, kernel_size=1, bias=True) fused into the
            # last layer's conv2 kernel.
            h = spectral_transform_forward(h, p, stride=stride, out_dtype=jnp.float32,
                                           final_w=params["final_w"],
                                           final_b=params["final_b"])

    # Final conv has padding=1: padded positions equal the bias.
    _, N, H, W = h.shape
    out = h.reshape(N, H, W)
    bf = params["final_b"]
    padded = jnp.full((N, H + 2, W + 2), bf[0], dtype=out.dtype)
    padded = padded.at[:, 1:H + 1, 1:W + 1].set(out)
    return padded[:, None, :, :]           # (N, 1, H+2, W+2) NCHW


# ------------------------------ param init --------------------------------- #

def _conv_w(key, ci, co):
    # Stored transposed as (Cout, Cin) in bf16 for MXU-friendly matmuls.
    w = jax.random.normal(key, (co, ci), jnp.float32) / np.sqrt(ci)
    return w.astype(jnp.bfloat16)


def _bn_fold(key, c, eps=1e-5):
    k1, k2, k3, k4 = jax.random.split(key, 4)
    gamma = 1.0 + 0.1 * jax.random.normal(k1, (c,), jnp.float32)
    beta = 0.1 * jax.random.normal(k2, (c,), jnp.float32)
    running_mean = 0.1 * jax.random.normal(k3, (c,), jnp.float32)
    running_var = 1.0 + 0.5 * jax.random.uniform(k4, (c,), jnp.float32)
    scale = gamma / jnp.sqrt(running_var + eps)
    shift = beta - running_mean * scale
    return scale, shift


def make_st_params(key, c_in, c_out):
    assert c_out % 2 == 0
    c_half = c_out // 2
    k = jax.random.split(key, 5)
    conv1_scale, conv1_shift = _bn_fold(k[1], c_half)
    fu_scale, fu_shift = _bn_fold(k[3], 2 * c_half)
    return dict(
        conv1_w=_conv_w(k[0], c_in, c_half),                  # (c_half, c_in)
        conv1_scale=conv1_scale, conv1_shift=conv1_shift,
        fu_w=_conv_w(k[2], 2 * c_half, 2 * c_half),           # (2c, 2c) acting on [re; im]
        fu_scale=fu_scale, fu_shift=fu_shift,
        conv2_w=_conv_w(k[4], c_half, c_out),                 # (c_out, c_half)
    )


def init_params(key, input_nc, ndf, n_layers=3):
    keys = jax.random.split(key, n_layers + 1)
    layers = [(make_st_params(keys[0], input_nc, ndf), 1)]    # first FFC: stride 1
    nf_mult = 1
    for n in range(1, n_layers):
        nf_mult_prev = nf_mult
        nf_mult = min(2 ** n, 8)
        layers.append((make_st_params(keys[n], ndf * nf_mult_prev, ndf * nf_mult), 2))
    kf1, kf2 = jax.random.split(keys[n_layers], 2)
    final_w = _conv_w(kf1, ndf * nf_mult, 1)                  # (1, ndf*nf_mult)
    final_b = 0.1 * jax.random.normal(kf2, (1,), jnp.float32)
    return dict(ffc_layers=layers, final_w=final_w, final_b=final_b)


# ---------------------------------- main ------------------------------------ #

if __name__ == "__main__":
    key = jax.random.PRNGKey(0)
    kx, kp = jax.random.split(key)

    input_nc, ndf, n_layers = 4, 16, 3
    N, H, W = 2, 16, 16

    x = jax.random.normal(kx, (N, input_nc, H, W), jnp.float32)  # NCHW, like torch
    params = init_params(kp, input_nc, ndf, n_layers)

    fwd = jax.jit(lambda inp: no_norm_discriminator_forward(inp, params))
    out = jax.block_until_ready(fwd(x))

    # two stride-2 stages: 16 -> 8 -> 4; final 1x1 conv with padding=1: 4 -> 6
    assert out.shape == (N, 1, H // 4 + 2, W // 4 + 2), out.shape
    assert out.dtype == jnp.float32
    assert bool(jnp.all(jnp.isfinite(out)))
    print("KERNEL_OK")
</pallas_src>

<mosaic_0001>
module attributes {stable_mosaic.version = 11 : i64} {
  func.func @_conv1x1_affine_kernel(%arg0: i32, %arg1: memref<4x512xf32, #tpu.memory_space<vmem>>, %arg2: memref<8x4xbf16, #tpu.memory_space<vmem>>, %arg3: memref<8x1xf32, #tpu.memory_space<vmem>>, %arg4: memref<8x1xf32, #tpu.memory_space<vmem>>, %arg5: memref<8x512xf32, #tpu.memory_space<vmem>>) attributes {dimension_semantics = [#tpu.dimension_semantics<parallel>], iteration_bounds = array<i64: 1>, scalar_prefetch = 0 : i64, scratch_operands = 0 : i64, tpu.core_type = #tpu.core_type<tc>, window_params = [{transform_indices = @transform_0, window_bounds = array<i64: 4, 512>}, {pipeline_mode = #tpu.pipeline_mode<synchronous>, transform_indices = @transform_1, window_bounds = array<i64: 8, 4>}, {pipeline_mode = #tpu.pipeline_mode<synchronous>, transform_indices = @transform_2, window_bounds = array<i64: 8, 1>}, {pipeline_mode = #tpu.pipeline_mode<synchronous>, transform_indices = @transform_3, window_bounds = array<i64: 8, 1>}, {transform_indices = @transform_4, window_bounds = array<i64: 8, 512>}]} {
    %c0 = arith.constant 0 : index
    %c0_0 = arith.constant 0 : index
    %0 = vector.load %arg2[%c0, %c0_0] : memref<8x4xbf16, #tpu.memory_space<vmem>>, vector<8x4xbf16>
    %c0_1 = arith.constant 0 : index
    %c0_2 = arith.constant 0 : index
    %1 = vector.load %arg1[%c0_1, %c0_2] : memref<4x512xf32, #tpu.memory_space<vmem>>, vector<4x512xf32>
    %2 = arith.truncf %1 : vector<4x512xf32> to vector<4x512xbf16>
    %cst = arith.constant dense<0.000000e+00> : vector<8x512xf32>
    %3 = tpu.matmul %0, %2, %cst {dimension_numbers = #tpu.dot_dimension_numbers<[1], [0], [0], [1], [0, 0, 1, 1], [], []>} : vector<8x4xbf16>, vector<4x512xbf16>, vector<8x512xf32> -> vector<8x512xf32>
    %c0_3 = arith.constant 0 : index
    %c0_4 = arith.constant 0 : index
    %4 = vector.load %arg3[%c0_3, %c0_4] : memref<8x1xf32, #tpu.memory_space<vmem>>, vector<8x1xf32>
    %5 = vector.broadcast %4 : vector<8x1xf32> to vector<8x512xf32>
    %6 = arith.mulf %3, %5 : vector<8x512xf32>
    %c0_5 = arith.constant 0 : index
    %c0_6 = arith.constant 0 : index
    %7 = vector.load %arg4[%c0_5, %c0_6] : memref<8x1xf32, #tpu.memory_space<vmem>>, vector<8x1xf32>
    %8 = vector.broadcast %7 : vector<8x1xf32> to vector<8x512xf32>
    %9 = arith.addf %6, %8 : vector<8x512xf32>
    %cst_7 = arith.constant 0.000000e+00 : f32
    %10 = vector.broadcast %cst_7 : f32 to vector<8x512xf32>
    %11 = arith.maximumf %9, %10 : vector<8x512xf32>
    %c0_8 = arith.constant 0 : index
    %c0_9 = arith.constant 0 : index
    %12 = vector.load %arg5[%c0_8, %c0_9] : memref<8x512xf32, #tpu.memory_space<vmem>>, vector<8x512xf32>
    tpu.vector_store %arg5[%c0_8, %c0_9], %11 {strides = array<i32>} : memref<8x512xf32, #tpu.memory_space<vmem>>, vector<8x512xf32>,
    return
  }
  func.func @transform_0(%arg0: i32) -> (i32, i32) {
    %c0_i32 = arith.constant 0 : i32
    %c0_i32_0 = arith.constant 0 : i32
    return %c0_i32, %arg0 : i32, i32
  }
  func.func @transform_1(%arg0: i32) -> (i32, i32) {
    %c0_i32 = arith.constant 0 : i32
    %c0_i32_0 = arith.constant 0 : i32
    %c0_i32_1 = arith.constant 0 : i32
    return %c0_i32, %c0_i32_0 : i32, i32
  }
  func.func @transform_2(%arg0: i32) -> (i32, i32) {
    %c0_i32 = arith.constant 0 : i32
    %c0_i32_0 = arith.constant 0 : i32
    %c0_i32_1 = arith.constant 0 : i32
    return %c0_i32, %c0_i32_0 : i32, i32
  }
  func.func @transform_3(%arg0: i32) -> (i32, i32) {
    %c0_i32 = arith.constant 0 : i32
    %c0_i32_0 = arith.constant 0 : i32
    %c0_i32_1 = arith.constant 0 : i32
    return %c0_i32, %c0_i32_0 : i32, i32
  }
  func.func @transform_4(%arg0: i32) -> (i32, i32) {
    %c0_i32 = arith.constant 0 : i32
    %c0_i32_0 = arith.constant 0 : i32
    return %c0_i32, %arg0 : i32, i32
  }
}

module attributes {stable_mosaic.version = 11 : i64} {
  func.func @_fourier_unit_kernel(%arg0: i32, %arg1: memref<16x384xbf16, #tpu.memory_space<vmem>>, %arg2: memref<16x16xbf16, #tpu.memory_space<vmem>>, %arg3: memref<16x1xf32, #tpu.memory_space<vmem>>, %arg4: memref<16x1xf32, #tpu.memory_space<vmem>>, %arg5: memref<8x384xf32, #tpu.memory_space<vmem>>, %arg6: memref<8x384xf32, #tpu.memory_space<vmem>>) attributes {dimension_semantics = [#tpu.dimension_semantics<parallel>], iteration_bounds = array<i64: 1>, scalar_prefetch = 0 : i64, scratch_operands = 0 : i64, tpu.core_type = #tpu.core_type<tc>, window_params = [{transform_indices = @transform_0, window_bounds = array<i64: 16, 384>}, {pipeline_mode = #tpu.pipeline_mode<synchronous>, transform_indices = @transform_1, window_bounds = array<i64: 16, 16>}, {pipeline_mode = #tpu.pipeline_mode<synchronous>, transform_indices = @transform_2, window_bounds = array<i64: 16, 1>}, {pipeline_mode = #tpu.pipeline_mode<synchronous>, transform_indices = @transform_3, window_bounds = array<i64: 16, 1>}, {transform_indices = @transform_4, window_bounds = array<i64: 8, 384>}, {transform_indices = @transform_5, window_bounds = array<i64: 8, 384>}]} {
    %c0 = arith.constant 0 : index
    %c0_0 = arith.constant 0 : index
    %0 = vector.load %arg2[%c0, %c0_0] : memref<16x16xbf16, #tpu.memory_space<vmem>>, vector<16x16xbf16>
    %c0_1 = arith.constant 0 : index
    %c0_2 = arith.constant 0 : index
    %1 = vector.load %arg1[%c0_1, %c0_2] : memref<16x384xbf16, #tpu.memory_space<vmem>>, vector<16x384xbf16>
    %cst = arith.constant dense<0.000000e+00> : vector<16x384xf32>
    %2 = tpu.matmul %0, %1, %cst {dimension_numbers = #tpu.dot_dimension_numbers<[1], [0], [0], [1], [0, 0, 1, 1], [], []>} : vector<16x16xbf16>, vector<16x384xbf16>, vector<16x384xf32> -> vector<16x384xf32>
    %c0_3 = arith.constant 0 : index
    %c0_4 = arith.constant 0 : index
    %3 = vector.load %arg3[%c0_3, %c0_4] : memref<16x1xf32, #tpu.memory_space<vmem>>, vector<16x1xf32>
    %4 = vector.broadcast %3 : vector<16x1xf32> to vector<16x384xf32>
    %5 = arith.mulf %2, %4 : vector<16x384xf32>
    %c0_5 = arith.constant 0 : index
    %c0_6 = arith.constant 0 : index
    %6 = vector.load %arg4[%c0_5, %c0_6] : memref<16x1xf32, #tpu.memory_space<vmem>>, vector<16x1xf32>
    %7 = vector.broadcast %6 : vector<16x1xf32> to vector<16x384xf32>
    %8 = arith.addf %5, %7 : vector<16x384xf32>
    %cst_7 = arith.constant 0.000000e+00 : f32
    %9 = vector.broadcast %cst_7 : f32 to vector<16x384xf32>
    %10 = arith.maximumf %8, %9 : vector<16x384xf32>
    %11 = vector.extract_strided_slice %10 {offsets = [0, 0], sizes = [8, 384], strides = [1, 1]} : vector<16x384xf32> to vector<8x384xf32>
    %c0_8 = arith.constant 0 : index
    %c0_9 = arith.constant 0 : index
    %12 = vector.load %arg5[%c0_8, %c0_9] : memref<8x384xf32, #tpu.memory_space<vmem>>, vector<8x384xf32>
    tpu.vector_store %arg5[%c0_8, %c0_9], %11 {strides = array<i32>} : memref<8x384xf32, #tpu.memory_space<vmem>>, vector<8x384xf32>,
    %13 = vector.extract_strided_slice %10 {offsets = [8, 0], sizes = [8, 384], strides = [1, 1]} : vector<16x384xf32> to vector<8x384xf32>
    %c0_10 = arith.constant 0 : index
    %c0_11 = arith.constant 0 : index
    %14 = vector.load %arg6[%c0_10, %c0_11] : memref<8x384xf32, #tpu.memory_space<vmem>>, vector<8x384xf32>
    tpu.vector_store %arg6[%c0_10, %c0_11], %13 {strides = array<i32>} : memref<8x384xf32, #tpu.memory_space<vmem>>, vector<8x384xf32>,
    return
  }
  func.func @transform_0(%arg0: i32) -> (i32, i32) {
    %c0_i32 = arith.constant 0 : i32
    %c0_i32_0 = arith.constant 0 : i32
    return %c0_i32, %arg0 : i32, i32
  }
  func.func @transform_1(%arg0: i32) -> (i32, i32) {
    %c0_i32 = arith.constant 0 : i32
    %c0_i32_0 = arith.constant 0 : i32
    %c0_i32_1 = arith.constant 0 : i32
    return %c0_i32, %c0_i32_0 : i32, i32
  }
  func.func @transform_2(%arg0: i32) -> (i32, i32) {
    %c0_i32 = arith.constant 0 : i32
    %c0_i32_0 = arith.constant 0 : i32
    %c0_i32_1 = arith.constant 0 : i32
    return %c0_i32, %c0_i32_0 : i32, i32
  }
  func.func @transform_3(%arg0: i32) -> (i32, i32) {
    %c0_i32 = arith.constant 0 : i32
    %c0_i32_0 = arith.constant 0 : i32
    %c0_i32_1 = arith.constant 0 : i32
    return %c0_i32, %c0_i32_0 : i32, i32
  }
  func.func @transform_4(%arg0: i32) -> (i32, i32) {
    %c0_i32 = arith.constant 0 : i32
    %c0_i32_0 = arith.constant 0 : i32
    return %c0_i32, %arg0 : i32, i32
  }
  func.func @transform_5(%arg0: i32) -> (i32, i32) {
    %c0_i32 = arith.constant 0 : i32
    %c0_i32_0 = arith.constant 0 : i32
    return %c0_i32, %arg0 : i32, i32
  }
}

module attributes {stable_mosaic.version = 11 : i64} {
  func.func @_conv1x1_residual_kernel(%arg0: i32, %arg1: memref<8x512xf32, #tpu.memory_space<vmem>>, %arg2: memref<8x512xf32, #tpu.memory_space<vmem>>, %arg3: memref<16x8xbf16, #tpu.memory_space<vmem>>, %arg4: memref<16x512xbf16, #tpu.memory_space<vmem>>) attributes {dimension_semantics = [#tpu.dimension_semantics<parallel>], iteration_bounds = array<i64: 1>, scalar_prefetch = 0 : i64, scratch_operands = 0 : i64, tpu.core_type = #tpu.core_type<tc>, window_params = [{transform_indices = @transform_0, window_bounds = array<i64: 8, 512>}, {transform_indices = @transform_1, window_bounds = array<i64: 8, 512>}, {pipeline_mode = #tpu.pipeline_mode<synchronous>, transform_indices = @transform_2, window_bounds = array<i64: 16, 8>}, {transform_indices = @transform_3, window_bounds = array<i64: 16, 512>}]} {
    %c0 = arith.constant 0 : index
    %c0_0 = arith.constant 0 : index
    %0 = vector.load %arg1[%c0, %c0_0] : memref<8x512xf32, #tpu.memory_space<vmem>>, vector<8x512xf32>
    %c0_1 = arith.constant 0 : index
    %c0_2 = arith.constant 0 : index
    %1 = vector.load %arg2[%c0_1, %c0_2] : memref<8x512xf32, #tpu.memory_space<vmem>>, vector<8x512xf32>
    %2 = arith.addf %0, %1 : vector<8x512xf32>
    %3 = arith.truncf %2 : vector<8x512xf32> to vector<8x512xbf16>
    %c0_3 = arith.constant 0 : index
    %c0_4 = arith.constant 0 : index
    %4 = vector.load %arg3[%c0_3, %c0_4] : memref<16x8xbf16, #tpu.memory_space<vmem>>, vector<16x8xbf16>
    %cst = arith.constant dense<0.000000e+00> : vector<16x512xf32>
    %5 = tpu.matmul %4, %3, %cst {dimension_numbers = #tpu.dot_dimension_numbers<[1], [0], [0], [1], [0, 0, 1, 1], [], []>} : vector<16x8xbf16>, vector<8x512xbf16>, vector<16x512xf32> -> vector<16x512xf32>
    %cst_5 = arith.constant 0.000000e+00 : f32
    %6 = vector.broadcast %cst_5 : f32 to vector<16x512xf32>
    %7 = arith.cmpf oge, %5, %6 : vector<16x512xf32>
    %cst_6 = arith.constant 2.000000e-01 : f32
    %8 = vector.broadcast %cst_6 : f32 to vector<16x512xf32>
    %9 = arith.mulf %8, %5 : vector<16x512xf32>
    %10 = arith.select %7, %5, %9 : vector<16x512xi1>, vector<16x512xf32>
    %11 = arith.truncf %10 : vector<16x512xf32> to vector<16x512xbf16>
    %c0_7 = arith.constant 0 : index
    %c0_8 = arith.constant 0 : index
    %12 = vector.load %arg4[%c0_7, %c0_8] : memref<16x512xbf16, #tpu.memory_space<vmem>>, vector<16x512xbf16>
    tpu.vector_store %arg4[%c0_7, %c0_8], %11 {strides = array<i32>} : memref<16x512xbf16, #tpu.memory_space<vmem>>, vector<16x512xbf16>,
    return
  }
  func.func @transform_0(%arg0: i32) -> (i32, i32) {
    %c0_i32 = arith.constant 0 : i32
    %c0_i32_0 = arith.constant 0 : i32
    return %c0_i32, %arg0 : i32, i32
  }
  func.func @transform_1(%arg0: i32) -> (i32, i32) {
    %c0_i32 = arith.constant 0 : i32
    %c0_i32_0 = arith.constant 0 : i32
    return %c0_i32, %arg0 : i32, i32
  }
  func.func @transform_2(%arg0: i32) -> (i32, i32) {
    %c0_i32 = arith.constant 0 : i32
    %c0_i32_0 = arith.constant 0 : i32
    %c0_i32_1 = arith.constant 0 : i32
    return %c0_i32, %c0_i32_0 : i32, i32
  }
  func.func @transform_3(%arg0: i32) -> (i32, i32) {
    %c0_i32 = arith.constant 0 : i32
    %c0_i32_0 = arith.constant 0 : i32
    return %c0_i32, %arg0 : i32, i32
  }
}

module attributes {stable_mosaic.version = 11 : i64} {
  func.func @_conv1x1_affine_kernel(%arg0: i32, %arg1: memref<16x128xbf16, #tpu.memory_space<vmem>>, %arg2: memref<16x16xbf16, #tpu.memory_space<vmem>>, %arg3: memref<16x1xf32, #tpu.memory_space<vmem>>, %arg4: memref<16x1xf32, #tpu.memory_space<vmem>>, %arg5: memref<16x128xf32, #tpu.memory_space<vmem>>) attributes {dimension_semantics = [#tpu.dimension_semantics<parallel>], iteration_bounds = array<i64: 1>, scalar_prefetch = 0 : i64, scratch_operands = 0 : i64, tpu.core_type = #tpu.core_type<tc>, window_params = [{transform_indices = @transform_0, window_bounds = array<i64: 16, 128>}, {pipeline_mode = #tpu.pipeline_mode<synchronous>, transform_indices = @transform_1, window_bounds = array<i64: 16, 16>}, {pipeline_mode = #tpu.pipeline_mode<synchronous>, transform_indices = @transform_2, window_bounds = array<i64: 16, 1>}, {pipeline_mode = #tpu.pipeline_mode<synchronous>, transform_indices = @transform_3, window_bounds = array<i64: 16, 1>}, {transform_indices = @transform_4, window_bounds = array<i64: 16, 128>}]} {
    %c0 = arith.constant 0 : index
    %c0_0 = arith.constant 0 : index
    %0 = vector.load %arg2[%c0, %c0_0] : memref<16x16xbf16, #tpu.memory_space<vmem>>, vector<16x16xbf16>
    %c0_1 = arith.constant 0 : index
    %c0_2 = arith.constant 0 : index
    %1 = vector.load %arg1[%c0_1, %c0_2] : memref<16x128xbf16, #tpu.memory_space<vmem>>, vector<16x128xbf16>
    %cst = arith.constant dense<0.000000e+00> : vector<16x128xf32>
    %2 = tpu.matmul %0, %1, %cst {dimension_numbers = #tpu.dot_dimension_numbers<[1], [0], [0], [1], [0, 0, 1, 1], [], []>} : vector<16x16xbf16>, vector<16x128xbf16>, vector<16x128xf32> -> vector<16x128xf32>
    %c0_3 = arith.constant 0 : index
    %c0_4 = arith.constant 0 : index
    %3 = vector.load %arg3[%c0_3, %c0_4] : memref<16x1xf32, #tpu.memory_space<vmem>>, vector<16x1xf32>
    %4 = vector.broadcast %3 : vector<16x1xf32> to vector<16x128xf32>
    %5 = arith.mulf %2, %4 : vector<16x128xf32>
    %c0_5 = arith.constant 0 : index
    %c0_6 = arith.constant 0 : index
    %6 = vector.load %arg4[%c0_5, %c0_6] : memref<16x1xf32, #tpu.memory_space<vmem>>, vector<16x1xf32>
    %7 = vector.broadcast %6 : vector<16x1xf32> to vector<16x128xf32>
    %8 = arith.addf %5, %7 : vector<16x128xf32>
    %cst_7 = arith.constant 0.000000e+00 : f32
    %9 = vector.broadcast %cst_7 : f32 to vector<16x128xf32>
    %10 = arith.maximumf %8, %9 : vector<16x128xf32>
    %c0_8 = arith.constant 0 : index
    %c0_9 = arith.constant 0 : index
    %11 = vector.load %arg5[%c0_8, %c0_9] : memref<16x128xf32, #tpu.memory_space<vmem>>, vector<16x128xf32>
    tpu.vector_store %arg5[%c0_8, %c0_9], %10 {strides = array<i32>} : memref<16x128xf32, #tpu.memory_space<vmem>>, vector<16x128xf32>,
    return
  }
  func.func @transform_0(%arg0: i32) -> (i32, i32) {
    %c0_i32 = arith.constant 0 : i32
    %c0_i32_0 = arith.constant 0 : i32
    return %c0_i32, %arg0 : i32, i32
  }
  func.func @transform_1(%arg0: i32) -> (i32, i32) {
    %c0_i32 = arith.constant 0 : i32
    %c0_i32_0 = arith.constant 0 : i32
    %c0_i32_1 = arith.constant 0 : i32
    return %c0_i32, %c0_i32_0 : i32, i32
  }
  func.func @transform_2(%arg0: i32) -> (i32, i32) {
    %c0_i32 = arith.constant 0 : i32
    %c0_i32_0 = arith.constant 0 : i32
    %c0_i32_1 = arith.constant 0 : i32
    return %c0_i32, %c0_i32_0 : i32, i32
  }
  func.func @transform_3(%arg0: i32) -> (i32, i32) {
    %c0_i32 = arith.constant 0 : i32
    %c0_i32_0 = arith.constant 0 : i32
    %c0_i32_1 = arith.constant 0 : i32
    return %c0_i32, %c0_i32_0 : i32, i32
  }
  func.func @transform_4(%arg0: i32) -> (i32, i32) {
    %c0_i32 = arith.constant 0 : i32
    %c0_i32_0 = arith.constant 0 : i32
    return %c0_i32, %arg0 : i32, i32
  }
}

module attributes {stable_mosaic.version = 11 : i64} {
  func.func @_fourier_unit_kernel(%arg0: i32, %arg1: memref<32x128xbf16, #tpu.memory_space<vmem>>, %arg2: memref<32x32xbf16, #tpu.memory_space<vmem>>, %arg3: memref<32x1xf32, #tpu.memory_space<vmem>>, %arg4: memref<32x1xf32, #tpu.memory_space<vmem>>, %arg5: memref<16x128xf32, #tpu.memory_space<vmem>>, %arg6: memref<16x128xf32, #tpu.memory_space<vmem>>) attributes {dimension_semantics = [#tpu.dimension_semantics<parallel>], iteration_bounds = array<i64: 1>, scalar_prefetch = 0 : i64, scratch_operands = 0 : i64, tpu.core_type = #tpu.core_type<tc>, window_params = [{transform_indices = @transform_0, window_bounds = array<i64: 32, 128>}, {pipeline_mode = #tpu.pipeline_mode<synchronous>, transform_indices = @transform_1, window_bounds = array<i64: 32, 32>}, {pipeline_mode = #tpu.pipeline_mode<synchronous>, transform_indices = @transform_2, window_bounds = array<i64: 32, 1>}, {pipeline_mode = #tpu.pipeline_mode<synchronous>, transform_indices = @transform_3, window_bounds = array<i64: 32, 1>}, {transform_indices = @transform_4, window_bounds = array<i64: 16, 128>}, {transform_indices = @transform_5, window_bounds = array<i64: 16, 128>}]} {
    %c0 = arith.constant 0 : index
    %c0_0 = arith.constant 0 : index
    %0 = vector.load %arg2[%c0, %c0_0] : memref<32x32xbf16, #tpu.memory_space<vmem>>, vector<32x32xbf16>
    %c0_1 = arith.constant 0 : index
    %c0_2 = arith.constant 0 : index
    %1 = vector.load %arg1[%c0_1, %c0_2] : memref<32x128xbf16, #tpu.memory_space<vmem>>, vector<32x128xbf16>
    %cst = arith.constant dense<0.000000e+00> : vector<32x128xf32>
    %2 = tpu.matmul %0, %1, %cst {dimension_numbers = #tpu.dot_dimension_numbers<[1], [0], [0], [1], [0, 0, 1, 1], [], []>} : vector<32x32xbf16>, vector<32x128xbf16>, vector<32x128xf32> -> vector<32x128xf32>
    %c0_3 = arith.constant 0 : index
    %c0_4 = arith.constant 0 : index
    %3 = vector.load %arg3[%c0_3, %c0_4] : memref<32x1xf32, #tpu.memory_space<vmem>>, vector<32x1xf32>
    %4 = vector.broadcast %3 : vector<32x1xf32> to vector<32x128xf32>
    %5 = arith.mulf %2, %4 : vector<32x128xf32>
    %c0_5 = arith.constant 0 : index
    %c0_6 = arith.constant 0 : index
    %6 = vector.load %arg4[%c0_5, %c0_6] : memref<32x1xf32, #tpu.memory_space<vmem>>, vector<32x1xf32>
    %7 = vector.broadcast %6 : vector<32x1xf32> to vector<32x128xf32>
    %8 = arith.addf %5, %7 : vector<32x128xf32>
    %cst_7 = arith.constant 0.000000e+00 : f32
    %9 = vector.broadcast %cst_7 : f32 to vector<32x128xf32>
    %10 = arith.maximumf %8, %9 : vector<32x128xf32>
    %11 = vector.extract_strided_slice %10 {offsets = [0, 0], sizes = [16, 128], strides = [1, 1]} : vector<32x128xf32> to vector<16x128xf32>
    %c0_8 = arith.constant 0 : index
    %c0_9 = arith.constant 0 : index
    %12 = vector.load %arg5[%c0_8, %c0_9] : memref<16x128xf32, #tpu.memory_space<vmem>>, vector<16x128xf32>
    tpu.vector_store %arg5[%c0_8, %c0_9], %11 {strides = array<i32>} : memref<16x128xf32, #tpu.memory_space<vmem>>, vector<16x128xf32>,
    %13 = vector.extract_strided_slice %10 {offsets = [16, 0], sizes = [16, 128], strides = [1, 1]} : vector<32x128xf32> to vector<16x128xf32>
    %c0_10 = arith.constant 0 : index
    %c0_11 = arith.constant 0 : index
    %14 = vector.load %arg6[%c0_10, %c0_11] : memref<16x128xf32, #tpu.memory_space<vmem>>, vector<16x128xf32>
    tpu.vector_store %arg6[%c0_10, %c0_11], %13 {strides = array<i32>} : memref<16x128xf32, #tpu.memory_space<vmem>>, vector<16x128xf32>,
    return
  }
  func.func @transform_0(%arg0: i32) -> (i32, i32) {
    %c0_i32 = arith.constant 0 : i32
    %c0_i32_0 = arith.constant 0 : i32
    return %c0_i32, %arg0 : i32, i32
  }
  func.func @transform_1(%arg0: i32) -> (i32, i32) {
    %c0_i32 = arith.constant 0 : i32
    %c0_i32_0 = arith.constant 0 : i32
    %c0_i32_1 = arith.constant 0 : i32
    return %c0_i32, %c0_i32_0 : i32, i32
  }
  func.func @transform_2(%arg0: i32) -> (i32, i32) {
    %c0_i32 = arith.constant 0 : i32
    %c0_i32_0 = arith.constant 0 : i32
    %c0_i32_1 = arith.constant 0 : i32
    return %c0_i32, %c0_i32_0 : i32, i32
  }
  func.func @transform_3(%arg0: i32) -> (i32, i32) {
    %c0_i32 = arith.constant 0 : i32
    %c0_i32_0 = arith.constant 0 : i32
    %c0_i32_1 = arith.constant 0 : i32
    return %c0_i32, %c0_i32_0 : i32, i32
  }
  func.func @transform_4(%arg0: i32) -> (i32, i32) {
    %c0_i32 = arith.constant 0 : i32
    %c0_i32_0 = arith.constant 0 : i32
    return %c0_i32, %arg0 : i32, i32
  }
  func.func @transform_5(%arg0: i32) -> (i32, i32) {
    %c0_i32 = arith.constant 0 : i32
    %c0_i32_0 = arith.constant 0 : i32
    return %c0_i32, %arg0 : i32, i32
  }
}

module attributes {stable_mosaic.version = 11 : i64} {
  func.func @_conv1x1_residual_kernel(%arg0: i32, %arg1: memref<16x128xf32, #tpu.memory_space<vmem>>, %arg2: memref<16x128xf32, #tpu.memory_space<vmem>>, %arg3: memref<32x16xbf16, #tpu.memory_space<vmem>>, %arg4: memref<32x128xbf16, #tpu.memory_space<vmem>>) attributes {dimension_semantics = [#tpu.dimension_semantics<parallel>], iteration_bounds = array<i64: 1>, scalar_prefetch = 0 : i64, scratch_operands = 0 : i64, tpu.core_type = #tpu.core_type<tc>, window_params = [{transform_indices = @transform_0, window_bounds = array<i64: 16, 128>}, {transform_indices = @transform_1, window_bounds = array<i64: 16, 128>}, {pipeline_mode = #tpu.pipeline_mode<synchronous>, transform_indices = @transform_2, window_bounds = array<i64: 32, 16>}, {transform_indices = @transform_3, window_bounds = array<i64: 32, 128>}]} {
    %c0 = arith.constant 0 : index
    %c0_0 = arith.constant 0 : index
    %0 = vector.load %arg1[%c0, %c0_0] : memref<16x128xf32, #tpu.memory_space<vmem>>, vector<16x128xf32>
    %c0_1 = arith.constant 0 : index
    %c0_2 = arith.constant 0 : index
    %1 = vector.load %arg2[%c0_1, %c0_2] : memref<16x128xf32, #tpu.memory_space<vmem>>, vector<16x128xf32>
    %2 = arith.addf %0, %1 : vector<16x128xf32>
    %3 = arith.truncf %2 : vector<16x128xf32> to vector<16x128xbf16>
    %c0_3 = arith.constant 0 : index
    %c0_4 = arith.constant 0 : index
    %4 = vector.load %arg3[%c0_3, %c0_4] : memref<32x16xbf16, #tpu.memory_space<vmem>>, vector<32x16xbf16>
    %cst = arith.constant dense<0.000000e+00> : vector<32x128xf32>
    %5 = tpu.matmul %4, %3, %cst {dimension_numbers = #tpu.dot_dimension_numbers<[1], [0], [0], [1], [0, 0, 1, 1], [], []>} : vector<32x16xbf16>, vector<16x128xbf16>, vector<32x128xf32> -> vector<32x128xf32>
    %cst_5 = arith.constant 0.000000e+00 : f32
    %6 = vector.broadcast %cst_5 : f32 to vector<32x128xf32>
    %7 = arith.cmpf oge, %5, %6 : vector<32x128xf32>
    %cst_6 = arith.constant 2.000000e-01 : f32
    %8 = vector.broadcast %cst_6 : f32 to vector<32x128xf32>
    %9 = arith.mulf %8, %5 : vector<32x128xf32>
    %10 = arith.select %7, %5, %9 : vector<32x128xi1>, vector<32x128xf32>
    %11 = arith.truncf %10 : vector<32x128xf32> to vector<32x128xbf16>
    %c0_7 = arith.constant 0 : index
    %c0_8 = arith.constant 0 : index
    %12 = vector.load %arg4[%c0_7, %c0_8] : memref<32x128xbf16, #tpu.memory_space<vmem>>, vector<32x128xbf16>
    tpu.vector_store %arg4[%c0_7, %c0_8], %11 {strides = array<i32>} : memref<32x128xbf16, #tpu.memory_space<vmem>>, vector<32x128xbf16>,
    return
  }
  func.func @transform_0(%arg0: i32) -> (i32, i32) {
    %c0_i32 = arith.constant 0 : i32
    %c0_i32_0 = arith.constant 0 : i32
    return %c0_i32, %arg0 : i32, i32
  }
  func.func @transform_1(%arg0: i32) -> (i32, i32) {
    %c0_i32 = arith.constant 0 : i32
    %c0_i32_0 = arith.constant 0 : i32
    return %c0_i32, %arg0 : i32, i32
  }
  func.func @transform_2(%arg0: i32) -> (i32, i32) {
    %c0_i32 = arith.constant 0 : i32
    %c0_i32_0 = arith.constant 0 : i32
    %c0_i32_1 = arith.constant 0 : i32
    return %c0_i32, %c0_i32_0 : i32, i32
  }
  func.func @transform_3(%arg0: i32) -> (i32, i32) {
    %c0_i32 = arith.constant 0 : i32
    %c0_i32_0 = arith.constant 0 : i32
    return %c0_i32, %arg0 : i32, i32
  }
}

module attributes {stable_mosaic.version = 11 : i64} {
  func.func @_conv1x1_affine_kernel(%arg0: i32, %arg1: memref<32x32xbf16, #tpu.memory_space<vmem>>, %arg2: memref<32x32xbf16, #tpu.memory_space<vmem>>, %arg3: memref<32x1xf32, #tpu.memory_space<vmem>>, %arg4: memref<32x1xf32, #tpu.memory_space<vmem>>, %arg5: memref<32x32xf32, #tpu.memory_space<vmem>>) attributes {dimension_semantics = [#tpu.dimension_semantics<parallel>], iteration_bounds = array<i64: 1>, scalar_prefetch = 0 : i64, scratch_operands = 0 : i64, tpu.core_type = #tpu.core_type<tc>, window_params = [{transform_indices = @transform_0, window_bounds = array<i64: 32, 32>}, {pipeline_mode = #tpu.pipeline_mode<synchronous>, transform_indices = @transform_1, window_bounds = array<i64: 32, 32>}, {pipeline_mode = #tpu.pipeline_mode<synchronous>, transform_indices = @transform_2, window_bounds = array<i64: 32, 1>}, {pipeline_mode = #tpu.pipeline_mode<synchronous>, transform_indices = @transform_3, window_bounds = array<i64: 32, 1>}, {transform_indices = @transform_4, window_bounds = array<i64: 32, 32>}]} {
    %c0 = arith.constant 0 : index
    %c0_0 = arith.constant 0 : index
    %0 = vector.load %arg2[%c0, %c0_0] : memref<32x32xbf16, #tpu.memory_space<vmem>>, vector<32x32xbf16>
    %c0_1 = arith.constant 0 : index
    %c0_2 = arith.constant 0 : index
    %1 = vector.load %arg1[%c0_1, %c0_2] : memref<32x32xbf16, #tpu.memory_space<vmem>>, vector<32x32xbf16>
    %cst = arith.constant dense<0.000000e+00> : vector<32x32xf32>
    %2 = tpu.matmul %0, %1, %cst {dimension_numbers = #tpu.dot_dimension_numbers<[1], [0], [0], [1], [0, 0, 1, 1], [], []>} : vector<32x32xbf16>, vector<32x32xbf16>, vector<32x32xf32> -> vector<32x32xf32>
    %c0_3 = arith.constant 0 : index
    %c0_4 = arith.constant 0 : index
    %3 = vector.load %arg3[%c0_3, %c0_4] : memref<32x1xf32, #tpu.memory_space<vmem>>, vector<32x1xf32>
    %4 = vector.broadcast %3 : vector<32x1xf32> to vector<32x32xf32>
    %5 = arith.mulf %2, %4 : vector<32x32xf32>
    %c0_5 = arith.constant 0 : index
    %c0_6 = arith.constant 0 : index
    %6 = vector.load %arg4[%c0_5, %c0_6] : memref<32x1xf32, #tpu.memory_space<vmem>>, vector<32x1xf32>
    %7 = vector.broadcast %6 : vector<32x1xf32> to vector<32x32xf32>
    %8 = arith.addf %5, %7 : vector<32x32xf32>
    %cst_7 = arith.constant 0.000000e+00 : f32
    %9 = vector.broadcast %cst_7 : f32 to vector<32x32xf32>
    %10 = arith.maximumf %8, %9 : vector<32x32xf32>
    %c0_8 = arith.constant 0 : index
    %c0_9 = arith.constant 0 : index
    %11 = vector.load %arg5[%c0_8, %c0_9] : memref<32x32xf32, #tpu.memory_space<vmem>>, vector<32x32xf32>
    tpu.vector_store %arg5[%c0_8, %c0_9], %10 {strides = array<i32>} : memref<32x32xf32, #tpu.memory_space<vmem>>, vector<32x32xf32>,
    return
  }
  func.func @transform_0(%arg0: i32) -> (i32, i32) {
    %c0_i32 = arith.constant 0 : i32
    %c0_i32_0 = arith.constant 0 : i32
    return %c0_i32, %arg0 : i32, i32
  }
  func.func @transform_1(%arg0: i32) -> (i32, i32) {
    %c0_i32 = arith.constant 0 : i32
    %c0_i32_0 = arith.constant 0 : i32
    %c0_i32_1 = arith.constant 0 : i32
    return %c0_i32, %c0_i32_0 : i32, i32
  }
  func.func @transform_2(%arg0: i32) -> (i32, i32) {
    %c0_i32 = arith.constant 0 : i32
    %c0_i32_0 = arith.constant 0 : i32
    %c0_i32_1 = arith.constant 0 : i32
    return %c0_i32, %c0_i32_0 : i32, i32
  }
  func.func @transform_3(%arg0: i32) -> (i32, i32) {
    %c0_i32 = arith.constant 0 : i32
    %c0_i32_0 = arith.constant 0 : i32
    %c0_i32_1 = arith.constant 0 : i32
    return %c0_i32, %c0_i32_0 : i32, i32
  }
  func.func @transform_4(%arg0: i32) -> (i32, i32) {
    %c0_i32 = arith.constant 0 : i32
    %c0_i32_0 = arith.constant 0 : i32
    return %c0_i32, %arg0 : i32, i32
  }
}

module attributes {stable_mosaic.version = 11 : i64} {
  func.func @_fourier_unit_kernel(%arg0: i32, %arg1: memref<64x128xbf16, #tpu.memory_space<vmem>>, %arg2: memref<64x64xbf16, #tpu.memory_space<vmem>>, %arg3: memref<64x1xf32, #tpu.memory_space<vmem>>, %arg4: memref<64x1xf32, #tpu.memory_space<vmem>>, %arg5: memref<32x128xf32, #tpu.memory_space<vmem>>, %arg6: memref<32x128xf32, #tpu.memory_space<vmem>>) attributes {dimension_semantics = [#tpu.dimension_semantics<parallel>], iteration_bounds = array<i64: 1>, scalar_prefetch = 0 : i64, scratch_operands = 0 : i64, tpu.core_type = #tpu.core_type<tc>, window_params = [{transform_indices = @transform_0, window_bounds = array<i64: 64, 128>}, {pipeline_mode = #tpu.pipeline_mode<synchronous>, transform_indices = @transform_1, window_bounds = array<i64: 64, 64>}, {pipeline_mode = #tpu.pipeline_mode<synchronous>, transform_indices = @transform_2, window_bounds = array<i64: 64, 1>}, {pipeline_mode = #tpu.pipeline_mode<synchronous>, transform_indices = @transform_3, window_bounds = array<i64: 64, 1>}, {transform_indices = @transform_4, window_bounds = array<i64: 32, 128>}, {transform_indices = @transform_5, window_bounds = array<i64: 32, 128>}]} {
    %c0 = arith.constant 0 : index
    %c0_0 = arith.constant 0 : index
    %0 = vector.load %arg2[%c0, %c0_0] : memref<64x64xbf16, #tpu.memory_space<vmem>>, vector<64x64xbf16>
    %c0_1 = arith.constant 0 : index
    %c0_2 = arith.constant 0 : index
    %1 = vector.load %arg1[%c0_1, %c0_2] : memref<64x128xbf16, #tpu.memory_space<vmem>>, vector<64x128xbf16>
    %cst = arith.constant dense<0.000000e+00> : vector<64x128xf32>
    %2 = tpu.matmul %0, %1, %cst {dimension_numbers = #tpu.dot_dimension_numbers<[1], [0], [0], [1], [0, 0, 1, 1], [], []>} : vector<64x64xbf16>, vector<64x128xbf16>, vector<64x128xf32> -> vector<64x128xf32>
    %c0_3 = arith.constant 0 : index
    %c0_4 = arith.constant 0 : index
    %3 = vector.load %arg3[%c0_3, %c0_4] : memref<64x1xf32, #tpu.memory_space<vmem>>, vector<64x1xf32>
    %4 = vector.broadcast %3 : vector<64x1xf32> to vector<64x128xf32>
    %5 = arith.mulf %2, %4 : vector<64x128xf32>
    %c0_5 = arith.constant 0 : index
    %c0_6 = arith.constant 0 : index
    %6 = vector.load %arg4[%c0_5, %c0_6] : memref<64x1xf32, #tpu.memory_space<vmem>>, vector<64x1xf32>
    %7 = vector.broadcast %6 : vector<64x1xf32> to vector<64x128xf32>
    %8 = arith.addf %5, %7 : vector<64x128xf32>
    %cst_7 = arith.constant 0.000000e+00 : f32
    %9 = vector.broadcast %cst_7 : f32 to vector<64x128xf32>
    %10 = arith.maximumf %8, %9 : vector<64x128xf32>
    %11 = vector.extract_strided_slice %10 {offsets = [0, 0], sizes = [32, 128], strides = [1, 1]} : vector<64x128xf32> to vector<32x128xf32>
    %c0_8 = arith.constant 0 : index
    %c0_9 = arith.constant 0 : index
    %12 = vector.load %arg5[%c0_8, %c0_9] : memref<32x128xf32, #tpu.memory_space<vmem>>, vector<32x128xf32>
    tpu.vector_store %arg5[%c0_8, %c0_9], %11 {strides = array<i32>} : memref<32x128xf32, #tpu.memory_space<vmem>>, vector<32x128xf32>,
    %13 = vector.extract_strided_slice %10 {offsets = [32, 0], sizes = [32, 128], strides = [1, 1]} : vector<64x128xf32> to vector<32x128xf32>
    %c0_10 = arith.constant 0 : index
    %c0_11 = arith.constant 0 : index
    %14 = vector.load %arg6[%c0_10, %c0_11] : memref<32x128xf32, #tpu.memory_space<vmem>>, vector<32x128xf32>
    tpu.vector_store %arg6[%c0_10, %c0_11], %13 {strides = array<i32>} : memref<32x128xf32, #tpu.memory_space<vmem>>, vector<32x128xf32>,
    return
  }
  func.func @transform_0(%arg0: i32) -> (i32, i32) {
    %c0_i32 = arith.constant 0 : i32
    %c0_i32_0 = arith.constant 0 : i32
    return %c0_i32, %arg0 : i32, i32
  }
  func.func @transform_1(%arg0: i32) -> (i32, i32) {
    %c0_i32 = arith.constant 0 : i32
    %c0_i32_0 = arith.constant 0 : i32
    %c0_i32_1 = arith.constant 0 : i32
    return %c0_i32, %c0_i32_0 : i32, i32
  }
  func.func @transform_2(%arg0: i32) -> (i32, i32) {
    %c0_i32 = arith.constant 0 : i32
    %c0_i32_0 = arith.constant 0 : i32
    %c0_i32_1 = arith.constant 0 : i32
    return %c0_i32, %c0_i32_0 : i32, i32
  }
  func.func @transform_3(%arg0: i32) -> (i32, i32) {
    %c0_i32 = arith.constant 0 : i32
    %c0_i32_0 = arith.constant 0 : i32
    %c0_i32_1 = arith.constant 0 : i32
    return %c0_i32, %c0_i32_0 : i32, i32
  }
  func.func @transform_4(%arg0: i32) -> (i32, i32) {
    %c0_i32 = arith.constant 0 : i32
    %c0_i32_0 = arith.constant 0 : i32
    return %c0_i32, %arg0 : i32, i32
  }
  func.func @transform_5(%arg0: i32) -> (i32, i32) {
    %c0_i32 = arith.constant 0 : i32
    %c0_i32_0 = arith.constant 0 : i32
    return %c0_i32, %arg0 : i32, i32
  }
}

module attributes {stable_mosaic.version = 11 : i64} {
  func.func @_conv1x1_residual_final_kernel(%arg0: i32, %arg1: memref<32x32xf32, #tpu.memory_space<vmem>>, %arg2: memref<32x32xf32, #tpu.memory_space<vmem>>, %arg3: memref<64x32xbf16, #tpu.memory_space<vmem>>, %arg4: memref<1x64xbf16, #tpu.memory_space<vmem>>, %arg5: memref<1x1xf32, #tpu.memory_space<vmem>>, %arg6: memref<1x32xf32, #tpu.memory_space<vmem>>) attributes {dimension_semantics = [#tpu.dimension_semantics<parallel>], iteration_bounds = array<i64: 1>, scalar_prefetch = 0 : i64, scratch_operands = 0 : i64, tpu.core_type = #tpu.core_type<tc>, window_params = [{transform_indices = @transform_0, window_bounds = array<i64: 32, 32>}, {transform_indices = @transform_1, window_bounds = array<i64: 32, 32>}, {pipeline_mode = #tpu.pipeline_mode<synchronous>, transform_indices = @transform_2, window_bounds = array<i64: 64, 32>}, {pipeline_mode = #tpu.pipeline_mode<synchronous>, transform_indices = @transform_3, window_bounds = array<i64: 1, 64>}, {pipeline_mode = #tpu.pipeline_mode<synchronous>, transform_indices = @transform_4, window_bounds = array<i64: 1, 1>}, {transform_indices = @transform_5, window_bounds = array<i64: 1, 32>}]} {
    %c0 = arith.constant 0 : index
    %c0_0 = arith.constant 0 : index
    %0 = vector.load %arg1[%c0, %c0_0] : memref<32x32xf32, #tpu.memory_space<vmem>>, vector<32x32xf32>
    %c0_1 = arith.constant 0 : index
    %c0_2 = arith.constant 0 : index
    %1 = vector.load %arg2[%c0_1, %c0_2] : memref<32x32xf32, #tpu.memory_space<vmem>>, vector<32x32xf32>
    %2 = arith.addf %0, %1 : vector<32x32xf32>
    %3 = arith.truncf %2 : vector<32x32xf32> to vector<32x32xbf16>
    %c0_3 = arith.constant 0 : index
    %c0_4 = arith.constant 0 : index
    %4 = vector.load %arg3[%c0_3, %c0_4] : memref<64x32xbf16, #tpu.memory_space<vmem>>, vector<64x32xbf16>
    %cst = arith.constant dense<0.000000e+00> : vector<64x32xf32>
    %5 = tpu.matmul %4, %3, %cst {dimension_numbers = #tpu.dot_dimension_numbers<[1], [0], [0], [1], [0, 0, 1, 1], [], []>} : vector<64x32xbf16>, vector<32x32xbf16>, vector<64x32xf32> -> vector<64x32xf32>
    %cst_5 = arith.constant 0.000000e+00 : f32
    %6 = vector.broadcast %cst_5 : f32 to vector<64x32xf32>
    %7 = arith.cmpf oge, %5, %6 : vector<64x32xf32>
    %cst_6 = arith.constant 2.000000e-01 : f32
    %8 = vector.broadcast %cst_6 : f32 to vector<64x32xf32>
    %9 = arith.mulf %8, %5 : vector<64x32xf32>
    %10 = arith.select %7, %5, %9 : vector<64x32xi1>, vector<64x32xf32>
    %c0_7 = arith.constant 0 : index
    %c0_8 = arith.constant 0 : index
    %11 = vector.load %arg4[%c0_7, %c0_8] : memref<1x64xbf16, #tpu.memory_space<vmem>>, vector<1x64xbf16>
    %12 = arith.truncf %10 : vector<64x32xf32> to vector<64x32xbf16>
    %cst_9 = arith.constant dense<0.000000e+00> : vector<1x32xf32>
    %13 = tpu.matmul %11, %12, %cst_9 {dimension_numbers = #tpu.dot_dimension_numbers<[1], [0], [0], [1], [0, 0, 1, 1], [], []>} : vector<1x64xbf16>, vector<64x32xbf16>, vector<1x32xf32> -> vector<1x32xf32>
    %c0_10 = arith.constant 0 : index
    %c0_11 = arith.constant 0 : index
    %14 = vector.load %arg5[%c0_10, %c0_11] : memref<1x1xf32, #tpu.memory_space<vmem>>, vector<1x1xf32>
    %15 = vector.broadcast %14 : vector<1x1xf32> to vector<1x32xf32>
    %16 = arith.addf %13, %15 : vector<1x32xf32>
    %c0_12 = arith.constant 0 : index
    %c0_13 = arith.constant 0 : index
    %17 = vector.load %arg6[%c0_12, %c0_13] : memref<1x32xf32, #tpu.memory_space<vmem>>, vector<1x32xf32>
    tpu.vector_store %arg6[%c0_12, %c0_13], %16 {strides = array<i32>} : memref<1x32xf32, #tpu.memory_space<vmem>>, vector<1x32xf32>,
    return
  }
  func.func @transform_0(%arg0: i32) -> (i32, i32) {
    %c0_i32 = arith.constant 0 : i32
    %c0_i32_0 = arith.constant 0 : i32
    return %c0_i32, %arg0 : i32, i32
  }
  func.func @transform_1(%arg0: i32) -> (i32, i32) {
    %c0_i32 = arith.constant 0 : i32
    %c0_i32_0 = arith.constant 0 : i32
    return %c0_i32, %arg0 : i32, i32
  }
  func.func @transform_2(%arg0: i32) -> (i32, i32) {
    %c0_i32 = arith.constant 0 : i32
    %c0_i32_0 = arith.constant 0 : i32
    %c0_i32_1 = arith.constant 0 : i32
    return %c0_i32, %c0_i32_0 : i32, i32
  }
  func.func @transform_3(%arg0: i32) -> (i32, i32) {
    %c0_i32 = arith.constant 0 : i32
    %c0_i32_0 = arith.constant 0 : i32
    %c0_i32_1 = arith.constant 0 : i32
    return %c0_i32, %c0_i32_0 : i32, i32
  }
  func.func @transform_4(%arg0: i32) -> (i32, i32) {
    %c0_i32 = arith.constant 0 : i32
    %c0_i32_0 = arith.constant 0 : i32
    %c0_i32_1 = arith.constant 0 : i32
    return %c0_i32, %c0_i32_0 : i32, i32
  }
  func.func @transform_5(%arg0: i32) -> (i32, i32) {
    %c0_i32 = arith.constant 0 : i32
    %c0_i32_0 = arith.constant 0 : i32
    return %c0_i32, %arg0 : i32, i32
  }
}

</mosaic_0001>

<bundles_post_ra>
// kernel: _lambda_.9
= control target key start
LH: loop header
LB: loop body
LE: loop exit
PB: predicated region body
PF: predicated region fallthrough
CT: control target
= control target key end

     0   :  { %vm35_vm0 = vcmask 1041408   ;;  %v170_v2 = vmov 0   ;;  %vm31_vm1 = vcmask 31744   ;;  %s227_s0 = inlined_call_operand.vmem [shape: f32[4,512], index: 0, kind: input, shape index: {}]   ;;  %s228_s2 = inlined_call_operand.vmem [shape: f32[8,1], index: 2, kind: input, shape index: {}]   ;;  %s229_s3 = inlined_call_operand.vmem [shape: f32[8,1], index: 3, kind: input, shape index: {}]   ;;  %s230_s1 = inlined_call_operand.vmem [shape: bf16[8,4], index: 1, kind: input, shape index: {}]   ;;  %s231_s4 = inlined_call_operand.vmem [shape: f32[8,512], index: 4, kind: output, shape index: {}]  }
   0x1   :  { %v19_v0 = vld [vmem:[%s227_s0] sm:$0xff]  ;;  %v20_v1 = vld [vmem:[%s227_s0 + $0x8] sm:$0xff]  ;;  %80 = vmatprep.mubr.bf16.mxu0 %v170_v2  ;;  %121 = vmatprep.mubr.bf16.mxu1 %v170_v2 }
   0x2   :  { %v23_v3 = vcombine.high %v19_v0, %v19_v0  ;;  %v24_v4 = vcombine.high %v20_v1, %v20_v1  ;;  %v27_v5 = vpack.c.bf16 %v19_v0, %v19_v0  ;;  %v29_v6 = vpack.c.bf16 %v20_v1, %v20_v1  ;;  %167 = vset.pattern.permute.xlu0 %v170_v2  ;;  %v130_v7 = vld [vmem:[%s228_s2] sm:$0xff] }
   0x3   :  { %133 = vperm.xlu0 %167, %v130_v7   ;;  %v140_v12 = vld [vmem:[%s229_s3] sm:$0xff] }
   0x4   :  { %v28_v8 = vpack.c.bf16 %v23_v3, %v23_v3  ;;  %v30_v9 = vpack.c.bf16 %v24_v4, %v24_v4  ;;  %v37_v10 = vsel %vm35_vm0, %v27_v5, 0  ;;  %v43_v11 = vsel %vm35_vm0, %v29_v6, 0  ;;  %v18_v13 = vld [vmem:[%s230_s1] sm:$0xf] }
   0x6   :  { %162 = vmatprep.subr.msk.bf16.mxu0 %vm35_vm0, %v28_v8  ;;  %164 = vmatprep.subr.msk.bf16.mxu1 %vm35_vm0, %v30_v9 }
   0x7   :  { %63 = vmatpush1.bf16.msra.mxu0 %v37_v10  ;;  %104 = vmatpush1.bf16.msra.mxu1 %v43_v11 }
   0x8   :  { %143 = vperm.xlu0 %167, %v140_v12  }
   0xa   :  { %163 = vmatmul.mubr.msk.bf16.vlgmr.msra.gmra.mxu0 %vm31_vm1, %v18_v13  ;;  %165 = vmatmul.mubr.msk.bf16.vlgmr.msra.gmra.mxu1 %vm31_vm1, %v18_v13 }
  0x7e   :  { %v134_v14 = vpop.permute.xlu0 %133 }
  0x83   :  { %v144_v17 = vpop.permute.xlu0 %143 }
  0xca   :  { %v82_v15 = vpop.f32.mrf.mxu0  ;;  %v123_v16 = vpop.f32.mrf.mxu1 }
  0xcb   :  { %v136_v18 = vmul.f32 %v134_v14, %v82_v15  ;;  %v138_v19 = vmul.f32 %v134_v14, %v123_v16 }
  0xcc   :  { %v84_v20 = vpop.f32.mrf.mxu0  ;;  %v125_v21 = vpop.f32.mrf.mxu1 }
  0xcd   :  { %v146_v22 = vadd.f32 %v144_v17, %v136_v18  ;;  %v148_v23 = vadd.f32 %v144_v17, %v138_v19  ;;  %v137_v24 = vmul.f32 %v134_v14, %v84_v20  ;;  %v139_v25 = vmul.f32 %v134_v14, %v125_v21 }
  0xce   :  { %v86_v26 = vpop.f32.mrf.mxu0  ;;  %v127_v27 = vpop.f32.mrf.mxu1 }
  0xcf   :  { %v150_v28 = vmax.f32 %v146_v22, 0.0  ;;  %v152_v29 = vmax.f32 %v148_v23, 0.0  ;;  %v147_v30 = vadd.f32 %v144_v17, %v137_v24  ;;  %v149_v31 = vadd.f32 %v144_v17, %v139_v25 }
  0xd0   :  { %v87_v32 = vpop.f32.mrf.mxu0  ;;  %v128_v33 = vpop.f32.mrf.mxu1 }
  0xd1   :  { %154 = vst [vmem:[%s231_s4] sm:$0xff] %v150_v28  ;;  %156 = vst [vmem:[%s231_s4 + $0x10] sm:$0xff] %v152_v29  ;;  %v151_v34 = vmax.f32 %v147_v30, 0.0  ;;  %v153_v35 = vmax.f32 %v149_v31, 0.0 }
  0xd3   :  { %155 = vst [vmem:[%s231_s4 + $0x8] sm:$0xff] %v151_v34  ;;  %157 = vst [vmem:[%s231_s4 + $0x18] sm:$0xff] %v153_v35 }

// kernel: _lambda_.10
= control target key start
LH: loop header
LB: loop body
LE: loop exit
PB: predicated region body
PF: predicated region fallthrough
CT: control target
= control target key end

     0   :  { %v215_v0 = vmov 0.0   ;;  %vm216_vm0 = vmmov 0   ;;  %v217_v3 = vmov 0   ;;  %vm47_vm1 = vcmask 130048   ;;  %s290_s0 = inlined_call_operand.vmem [shape: bf16[16,384], index: 0, kind: input, shape index: {}]   ;;  %s291_s1 = inlined_call_operand.vmem [shape: bf16[16,16], index: 1, kind: input, shape index: {}]   ;;  %s292_s2 = inlined_call_operand.vmem [shape: f32[16,1], index: 2, kind: input, shape index: {}]   ;;  %s293_s3 = inlined_call_operand.vmem [shape: f32[16,1], index: 3, kind: input, shape index: {}]   ;;  %s294_s4 = inlined_call_operand.vmem [shape: f32[8,384], index: 4, kind: output, shape index: {0}]   ;;  %s295_s5 = inlined_call_operand.vmem [shape: f32[8,384], index: 5, kind: output, shape index: {1}]  }
   0x1   :  { %199 = vmatprep.subr.bf16.mxu1 %v215_v0  ;;  %v210_v1 = vld [vmem:[%s290_s0 + $0x4] ss:$12 sps:$4 sm:$0xff]   ;;  %201 = vmatprep.mubr.msk.bf16.mxu1 %vm216_vm0, %v215_v0  ;;  %v212_v2 = vld [vmem:[%s290_s0 + $0x8] ss:$12 sps:$4 sm:$0xff]   ;;  %v213_v4 = vld [vmem:[%s290_s0] ss:$12 sps:$4 sm:$0xff]  }
   0x2   :  { %83 = vmatprep.mubr.bf16.mxu0 %v217_v3  ;;  %208 = vset.pattern.permute.xlu0 %v217_v3  ;;  %v214_v5 = vld [vmem:[%s291_s1] sm:$0xff]   ;;  %v136_v8 = vld [vmem:[%s292_s2 + $0x8] sm:$0xff] }
   0x3   :  { %65 = vmatprep.subr.bf16.mxu0 %v210_v1  ;;  %209 = vset.pattern.permute.xlu1 %v217_v3  ;;  %v135_v6 = vld [vmem:[%s292_s2] sm:$0xff]  ;;  %v154_v9 = vld [vmem:[%s293_s3 + $0x8] sm:$0xff] }
   0x4   :  { %200 = vmatpush3.bf16.msra.mxu1 %v212_v2  ;;  %v153_v7 = vld [vmem:[%s293_s3] sm:$0xff]  ;;  %66 = vmatpush1.bf16.msra.mxu0 %v213_v4 }
   0x5   :  { %139 = vperm.xlu0 %208, %v135_v6   ;;  %157 = vperm.xlu1 %209, %v153_v7  }
   0x7   :  { %202 = vmatmul.mubr.msk.bf16.vlgmr.msra.gmra.mxu1 %vm47_vm1, %v214_v5  ;;  %195 = vmatmul.mubr.msk.bf16.vlgmr.msra.gmra.mxu0 %vm47_vm1, %v214_v5 }
   0x9   :  { %144 = vperm.xlu0 %208, %v136_v8   ;;  %162 = vperm.xlu1 %209, %v154_v9  }
  0x80   :  { %v140_v10 = vpop.permute.xlu0 %139  ;;  %v158_v11 = vpop.permute.xlu1 %157 }
  0x84   :  { %v145_v17 = vpop.permute.xlu0 %144  ;;  %v163_v23 = vpop.permute.xlu1 %162 }
  0xc7   :  { %v128_v12 = vpop.f32.mrf.mxu1  ;;  %v85_v14 = vpop.f32.mrf.mxu0 }
  0xc8   :  { %v149_v13 = vmul.f32 %v140_v10, %v128_v12  ;;  %v147_v15 = vmul.f32 %v140_v10, %v85_v14 }
  0xc9   :  { %v203_v16 = vpop.f32.mrf.mxu1  ;;  %v87_v19 = vpop.f32.mrf.mxu0 }
  0xca   :  { %v167_v18 = vadd.f32 %v158_v11, %v149_v13  ;;  %v165_v20 = vadd.f32 %v158_v11, %v147_v15  ;;  %v148_v21 = vmul.f32 %v140_v10, %v87_v19 }
  0xcb   :  { %v131_v22 = vpop.f32.mrf.mxu1  ;;  %v89_v26 = vpop.f32.mrf.mxu0 }
  0xcc   :  { %v173_v24 = vmax.f32 %v167_v18, 0.0  ;;  %v152_v25 = vmul.f32 %v145_v17, %v131_v22  ;;  %v171_v27 = vmax.f32 %v165_v20, 0.0  ;;  %v166_v28 = vadd.f32 %v158_v11, %v148_v21 }
  0xcd   :  { %v150_v29 = vmul.f32 %v145_v17, %v89_v26  ;;  %v204_v30 = vpop.f32.mrf.mxu1  ;;  %v91_v32 = vpop.f32.mrf.mxu0 }
  0xce   :  { %179 = vst [vmem:[%s294_s4 + $0x10] sm:$0xff] %v173_v24  ;;  %v170_v31 = vadd.f32 %v163_v23, %v152_v25  ;;  %177 = vst [vmem:[%s294_s4] sm:$0xff] %v171_v27  ;;  %v172_v33 = vmax.f32 %v166_v28, 0.0  ;;  %v151_v35 = vmul.f32 %v145_v17, %v91_v32 }
  0xcf   :  { %v168_v34 = vadd.f32 %v163_v23, %v150_v29 }
  0xd0   :  { %v176_v36 = vmax.f32 %v170_v31, 0.0  ;;  %178 = vst [vmem:[%s294_s4 + $0x8] sm:$0xff] %v172_v33  ;;  %v169_v38 = vadd.f32 %v163_v23, %v151_v35 }
  0xd1   :  { %v174_v37 = vmax.f32 %v168_v34, 0.0 }
  0xd2   :  { %182 = vst [vmem:[%s295_s5 + $0x10] sm:$0xff] %v176_v36  ;;  %v175_v39 = vmax.f32 %v169_v38, 0.0 }
  0xd3   :  { %180 = vst [vmem:[%s295_s5] sm:$0xff] %v174_v37 }
  0xd4   :  { %181 = vst [vmem:[%s295_s5 + $0x8] sm:$0xff] %v175_v39 }

// kernel: reverse.0
= control target key start
LH: loop header
LB: loop body
LE: loop exit
PB: predicated region body
PF: predicated region fallthrough
CT: control target
= control target key end

     0   :  { %v104_v3 = vlaneseq  ;;  %v97_v18 = vld [vmem:[#allocation0 + $0x7] ss:$-1 sm:$0xff]  ;;  %v111_v19 = vld [vmem:[#allocation0 + $0x17] ss:$-1 sm:$0xff]  ;;  %s606_s0 = inlined_call_operand.vmem [shape: f32[8,2,16,7], index: 0, kind: input, shape index: {}]   ;;  %s607_s1 = inlined_call_operand.vmem [shape: f32[8,2,16,7], index: 1, kind: output, shape index: {}]  }
   0x1   :  { %v61_v0 = vld [vmem:[%s606_s0] sm:$0xff]  ;;  %v63_v1 = vld [vmem:[%s606_s0 + $0x8] sm:$0xff]  ;;  %v65_v2 = vld [vmem:[%s606_s0 + $0x10] sm:$0xff]  ;;  %v98_v20 = vrot.slane %v97_v18, 1  ;;  %v112_v21 = vrot.slane %v111_v19, 1 }
   0x2   :  { %62 = vst [vmem:[#allocation0 + $0x8] sm:$0xff] %v61_v0  ;;  %64 = vst [vmem:[#allocation0 + $0x18] sm:$0xff] %v63_v1  ;;  %v67_v4 = vld [vmem:[%s606_s0 + $0x18] sm:$0xff]  ;;  %v69_v5 = vld [vmem:[%s606_s0 + $0x20] sm:$0xff]  ;;  %v502_v10 = vshrl.u32 %v104_v3, 7 }
   0x3   :  { %66 = vst [vmem:[#allocation0 + $0x28] sm:$0xff] %v65_v2  ;;  %v71_v6 = vld [vmem:[%s606_s0 + $0x28] sm:$0xff]  ;;  %68 = vst [vmem:[#allocation0 + $0x38] sm:$0xff] %v67_v4  ;;  %v73_v7 = vld [vmem:[%s606_s0 + $0x30] sm:$0xff] }
   0x4   :  { %70 = vst [vmem:[#allocation0 + $0x48] sm:$0xff] %v69_v5  ;;  %72 = vst [vmem:[#allocation0 + $0x58] sm:$0xff] %v71_v6  ;;  %v75_v8 = vld [vmem:[%s606_s0 + $0x38] sm:$0xff]  ;;  %v77_v9 = vld [vmem:[%s606_s0 + $0x40] sm:$0xff]  ;;  %vm106_vm0 = vcmp.lt.s32.totalorder %v502_v10, 7 }
   0x5   :  { %74 = vst [vmem:[#allocation0 + $0x68] sm:$0xff] %v73_v7  ;;  %76 = vst [vmem:[#allocation0 + $0x78] sm:$0xff] %v75_v8  ;;  %v79_v11 = vld [vmem:[%s606_s0 + $0x48] sm:$0xff]  ;;  %v81_v12 = vld [vmem:[%s606_s0 + $0x50] sm:$0xff] }
   0x6   :  { %78 = vst [vmem:[#allocation0 + $0x88] sm:$0xff] %v77_v9  ;;  %v83_v13 = vld [vmem:[%s606_s0 + $0x58] sm:$0xff]  ;;  %80 = vst [vmem:[#allocation0 + $0x98] sm:$0xff] %v79_v11  ;;  %v85_v14 = vld [vmem:[%s606_s0 + $0x60] sm:$0xff] }
   0x7   :  { %82 = vst [vmem:[#allocation0 + $0xa8] sm:$0xff] %v81_v12  ;;  %84 = vst [vmem:[#allocation0 + $0xb8] sm:$0xff] %v83_v13  ;;  %v87_v15 = vld [vmem:[%s606_s0 + $0x68] sm:$0xff]  ;;  %v89_v16 = vld [vmem:[%s606_s0 + $0x70] sm:$0xff] }
   0x8   :  { %86 = vst [vmem:[#allocation0 + $0xc8] sm:$0xff] %v85_v14  ;;  %88 = vst [vmem:[#allocation0 + $0xd8] sm:$0xff] %v87_v15  ;;  %v91_v17 = vld [vmem:[%s606_s0 + $0x78] sm:$0xff]  ;;  %v125_v22 = vld [vmem:[#allocation0 + $0x27] ss:$-1 sm:$0xff] }
   0x9   :  { %90 = vst [vmem:[#allocation0 + $0xe8] sm:$0xff] %v89_v16  ;;  %92 = vst [vmem:[#allocation0 + $0xf8] sm:$0xff] %v91_v17  ;;  %v139_v23 = vld [vmem:[#allocation0 + $0x37] ss:$-1 sm:$0xff]  ;;  %v126_v24 = vrot.slane %v125_v22, 1 }
   0xa   :  { %v140_v25 = vrot.slane %v139_v23, 1  ;;  %v153_v26 = vld [vmem:[#allocation0 + $0x47] ss:$-1 sm:$0xff]  ;;  %v167_v27 = vld [vmem:[#allocation0 + $0x57] ss:$-1 sm:$0xff]  ;;  %99 = vst [vmem:[#allocation1] sm:$0xff] %v98_v20 }
   0xb   :  { %v102_v28 = vld [vmem:[#allocation0 + $0xf] ss:$-1 sm:$0xff]  ;;  %113 = vst [vmem:[#allocation1 + $0x8] sm:$0xff] %v112_v21  ;;  %v116_v29 = vld [vmem:[#allocation0 + $0x1f] ss:$-1 sm:$0xff]  ;;  %127 = vst [vmem:[#allocation1 + $0x10] sm:$0xff] %v126_v24 }
   0xc   :  { %v130_v30 = vld [vmem:[#allocation0 + $0x2f] ss:$-1 sm:$0xff]  ;;  %v103_v31 = vrot.slane %v102_v28, 1  ;;  %v117_v32 = vrot.slane %v116_v29, 1  ;;  %141 = vst [vmem:[#allocation1 + $0x18] sm:$0xff] %v140_v25  ;;  %v154_v35 = vrot.slane %v153_v26, 1 }
   0xd   :  { %v131_v33 = vrot.slane %v130_v30, 1  ;;  %v144_v34 = vld [vmem:[#allocation0 + $0x3f] ss:$-1 sm:$0xff]  ;;  %v158_v37 = vld [vmem:[#allocation0 + $0x4f] ss:$-1 sm:$0xff]  ;;  %v168_v38 = vrot.slane %v167_v27, 1 }
   0xe   :  { %v145_v36 = vrot.slane %v144_v34, 1  ;;  %v172_v39 = vld [vmem:[#allocation0 + $0x5f] ss:$-1 sm:$0xff]  ;;  %107 = vst.msk [vmem:[#allocation1] sm:$0xff] %vm106_vm0, %v103_v31  ;;  %121 = vst.msk [vmem:[#allocation1 + $0x8] sm:$0xff] %vm106_vm0, %v117_v32  ;;  %v159_v40 = vrot.slane %v158_v37, 1 }
   0xf   :  { %135 = vst.msk [vmem:[#allocation1 + $0x10] sm:$0xff] %vm106_vm0, %v131_v33  ;;  %155 = vst [vmem:[#allocation1 + $0x20] sm:$0xff] %v154_v35  ;;  %v173_v41 = vrot.slane %v172_v39, 1  ;;  %v181_v42 = vld [vmem:[#allocation0 + $0x67] ss:$-1 sm:$0xff] }
  0x10   :  { %v186_v43 = vld [vmem:[#allocation0 + $0x6f] ss:$-1 sm:$0xff]  ;;  %149 = vst.msk [vmem:[#allocation1 + $0x18] sm:$0xff] %vm106_vm0, %v145_v36  ;;  %169 = vst [vmem:[#allocation1 + $0x28] sm:$0xff] %v168_v38  ;;  %v182_v44 = vrot.slane %v181_v42, 1 }
  0x11   :  { %v187_v45 = vrot.slane %v186_v43, 1  ;;  %v195_v46 = vld [vmem:[#allocation0 + $0x77] ss:$-1 sm:$0xff]  ;;  %v200_v47 = vld [vmem:[#allocation0 + $0x7f] ss:$-1 sm:$0xff]  ;;  %163 = vst.msk [vmem:[#allocation1 + $0x20] sm:$0xff] %vm106_vm0, %v159_v40 }
  0x12   :  { %177 = vst.msk [vmem:[#allocation1 + $0x28] sm:$0xff] %vm106_vm0, %v173_v41  ;;  %v196_v48 = vrot.slane %v195_v46, 1  ;;  %v201_v49 = vrot.slane %v200_v47, 1  ;;  %v209_v50 = vld [vmem:[#allocation0 + $0x87] ss:$-1 sm:$0xff]  ;;  %183 = vst [vmem:[#allocation1 + $0x30] sm:$0xff] %v182_v44 }
  0x13   :  { %v214_v51 = vld [vmem:[#allocation0 + $0x8f] ss:$-1 sm:$0xff]  ;;  %v210_v52 = vrot.slane %v209_v50, 1  ;;  %v223_v54 = vld [vmem:[#allocation0 + $0x97] ss:$-1 sm:$0xff]  ;;  %191 = vst.msk [vmem:[#allocation1 + $0x30] sm:$0xff] %vm106_vm0, %v187_v45 }
  0x14   :  { %v215_v53 = vrot.slane %v214_v51, 1  ;;  %v228_v55 = vld [vmem:[#allocation0 + $0x9f] ss:$-1 sm:$0xff]  ;;  %197 = vst [vmem:[#allocation1 + $0x38] sm:$0xff] %v196_v48  ;;  %v224_v56 = vrot.slane %v223_v54, 1 }
  0x15   :  { %v229_v57 = vrot.slane %v228_v55, 1  ;;  %v237_v58 = vld [vmem:[#allocation0 + $0xa7] ss:$-1 sm:$0xff]  ;;  %v242_v59 = vld [vmem:[#allocation0 + $0xaf] ss:$-1 sm:$0xff]  ;;  %205 = vst.msk [vmem:[#allocation1 + $0x38] sm:$0xff] %vm106_vm0, %v201_v49 }
  0x16   :  { %211 = vst [vmem:[#allocation1 + $0x40] sm:$0xff] %v210_v52  ;;  %v238_v60 = vrot.slane %v237_v58, 1  ;;  %v243_v61 = vrot.slane %v242_v59, 1  ;;  %v251_v62 = vld [vmem:[#allocation0 + $0xb7] ss:$-1 sm:$0xff]  ;;  %225 = vst [vmem:[#allocation1 + $0x48] sm:$0xff] %v224_v56 }
  0x17   :  { %v256_v63 = vld [vmem:[#allocation0 + $0xbf] ss:$-1 sm:$0xff]  ;;  %219 = vst.msk [vmem:[#allocation1 + $0x40] sm:$0xff] %vm106_vm0, %v215_v53  ;;  %v252_v0 = vrot.slane %v251_v62, 1  ;;  %v265_v2 = vld [vmem:[#allocation0 + $0xc7] ss:$-1 sm:$0xff] }
  0x18   :  { %v257_v1 = vrot.slane %v256_v63, 1  ;;  %v270_v3 = vld [vmem:[#allocation0 + $0xcf] ss:$-1 sm:$0xff]  ;;  %233 = vst.msk [vmem:[#allocation1 + $0x48] sm:$0xff] %vm106_vm0, %v229_v57  ;;  %239 = vst [vmem:[#allocation1 + $0x50] sm:$0xff] %v238_v60  ;;  %v266_v4 = vrot.slane %v265_v2, 1 }
  0x19   :  { %v271_v5 = vrot.slane %v270_v3, 1  ;;  %v279_v6 = vld [vmem:[#allocation0 + $0xd7] ss:$-1 sm:$0xff]  ;;  %v284_v7 = vld [vmem:[#allocation0 + $0xdf] ss:$-1 sm:$0xff]  ;;  %247 = vst.msk [vmem:[#allocation1 + $0x50] sm:$0xff] %vm106_vm0, %v243_v61 }
  0x1a   :  { %253 = vst [vmem:[#allocation1 + $0x58] sm:$0xff] %v252_v0  ;;  %v280_v8 = vrot.slane %v279_v6, 1  ;;  %v285_v9 = vrot.slane %v284_v7, 1  ;;  %v293_v11 = vld [vmem:[#allocation0 + $0xe7] ss:$-1 sm:$0xff]  ;;  %267 = vst [vmem:[#allocation1 + $0x60] sm:$0xff] %v266_v4 }
  0x1b   :  { %v298_v12 = vld [vmem:[#allocation0 + $0xef] ss:$-1 sm:$0xff]  ;;  %261 = vst.msk [vmem:[#allocation1 + $0x58] sm:$0xff] %vm106_vm0, %v257_v1  ;;  %v294_v13 = vrot.slane %v293_v11, 1  ;;  %v307_v15 = vld [vmem:[#allocation0 + $0xf7] ss:$-1 sm:$0xff] }
  0x1c   :  { %v299_v14 = vrot.slane %v298_v12, 1  ;;  %v312_v16 = vld [vmem:[#allocation0 + $0xff] ss:$-1 sm:$0xff]  ;;  %275 = vst.msk [vmem:[#allocation1 + $0x60] sm:$0xff] %vm106_vm0, %v271_v5  ;;  %281 = vst [vmem:[#allocation1 + $0x68] sm:$0xff] %v280_v8  ;;  %v308_v17 = vrot.slane %v307_v15, 1 }
  0x1d   :  { %v313_v18 = vrot.slane %v312_v16, 1  ;;  %v376_v19 = vld [vmem:[#allocation1] sm:$0xff]  ;;  %v378_v20 = vld [vmem:[#allocation1 + $0x8] sm:$0xff]  ;;  %v380_v21 = vld [vmem:[#allocation1 + $0x10] sm:$0xff]  ;;  %289 = vst.msk [vmem:[#allocation1 + $0x68] sm:$0xff] %vm106_vm0, %v285_v9 }
  0x1e   :  { %295 = vst [vmem:[#allocation1 + $0x70] sm:$0xff] %v294_v13  ;;  %377 = vst [vmem:[%s607_s1] sm:$0xff] %v376_v19  ;;  %v382_v22 = vld [vmem:[#allocation1 + $0x18] sm:$0xff]  ;;  %v384_v23 = vld [vmem:[#allocation1 + $0x20] sm:$0xff] }
  0x1f   :  { %379 = vst [vmem:[%s607_s1 + $0x8] sm:$0xff] %v378_v20  ;;  %381 = vst [vmem:[%s607_s1 + $0x10] sm:$0xff] %v380_v21  ;;  %v386_v24 = vld [vmem:[#allocation1 + $0x28] sm:$0xff]  ;;  %v388_v25 = vld [vmem:[#allocation1 + $0x30] sm:$0xff] }
  0x20   :  { %303 = vst.msk [vmem:[#allocation1 + $0x70] sm:$0xff] %vm106_vm0, %v299_v14  ;;  %309 = vst [vmem:[#allocation1 + $0x78] sm:$0xff] %v308_v17  ;;  %v390_v26 = vld [vmem:[#allocation1 + $0x38] sm:$0xff]  ;;  %v392_v10 = vld [vmem:[#allocation1 + $0x40] sm:$0xff] }
  0x21   :  { %383 = vst [vmem:[%s607_s1 + $0x18] sm:$0xff] %v382_v22  ;;  %385 = vst [vmem:[%s607_s1 + $0x20] sm:$0xff] %v384_v23  ;;  %v394_v27 = vld [vmem:[#allocation1 + $0x48] sm:$0xff]  ;;  %v396_v28 = vld [vmem:[#allocation1 + $0x50] sm:$0xff] }
  0x22   :  { %387 = vst [vmem:[%s607_s1 + $0x28] sm:$0xff] %v386_v24  ;;  %317 = vst.msk [vmem:[#allocation1 + $0x78] sm:$0xff] %vm106_vm0, %v313_v18  ;;  %v398_v29 = vld [vmem:[#allocation1 + $0x58] sm:$0xff] }
  0x23   :  { %389 = vst [vmem:[%s607_s1 + $0x30] sm:$0xff] %v388_v25  ;;  %391 = vst [vmem:[%s607_s1 + $0x38] sm:$0xff] %v390_v26  ;;  %v400_v30 = vld [vmem:[#allocation1 + $0x60] sm:$0xff] }
  0x24   :  { %393 = vst [vmem:[%s607_s1 + $0x40] sm:$0xff] %v392_v10  ;;  %395 = vst [vmem:[%s607_s1 + $0x48] sm:$0xff] %v394_v27  ;;  %v402_v31 = vld [vmem:[#allocation1 + $0x68] sm:$0xff] }
  0x25   :  { %397 = vst [vmem:[%s607_s1 + $0x50] sm:$0xff] %v396_v28  ;;  %399 = vst [vmem:[%s607_s1 + $0x58] sm:$0xff] %v398_v29 }
  0x26   :  { %401 = vst [vmem:[%s607_s1 + $0x60] sm:$0xff] %v400_v30  ;;  %403 = vst [vmem:[%s607_s1 + $0x68] sm:$0xff] %v402_v31 }
  0x27   :  { %v404_v32 = vld [vmem:[#allocation1 + $0x70] sm:$0xff] }
  0x28   :  { %405 = vst [vmem:[%s607_s1 + $0x70] sm:$0xff] %v404_v32 }
  0x29   :  { %v406_v33 = vld [vmem:[#allocation1 + $0x78] sm:$0xff] }
  0x2a   :  { %407 = vst [vmem:[%s607_s1 + $0x78] sm:$0xff] %v406_v33 }

// kernel: _lambda_.11
= control target key start
LH: loop header
LB: loop body
LE: loop exit
PB: predicated region body
PF: predicated region fallthrough
CT: control target
= control target key end

     0   :  { %v212_v3 = vmov 0   ;;  %vm42_vm0 = vcmask 1043456   ;;  %vm38_vm1 = vcmask 64512   ;;  %s272_s0 = inlined_call_operand.vmem [shape: f32[8,512], index: 0, kind: input, shape index: {}]   ;;  %s273_s1 = inlined_call_operand.vmem [shape: f32[8,512], index: 1, kind: input, shape index: {}]   ;;  %s274_s2 = inlined_call_operand.vmem [shape: bf16[16,8], index: 2, kind: input, shape index: {}]   ;;  %s275_s3 = inlined_call_operand.vmem [shape: bf16[16,512], index: 3, kind: output, shape index: {}]  }
   0x1   :  { %v16_v0 = vld [vmem:[%s272_s0 + $0x8] sm:$0xff]  ;;  %v18_v2 = vld [vmem:[%s272_s0 + $0x18] sm:$0xff]  ;;  %87 = vmatprep.mubr.bf16.mxu0 %v212_v3  ;;  %130 = vmatprep.mubr.bf16.mxu1 %v212_v3  ;;  %v15_v6 = vld [vmem:[%s272_s0] sm:$0xff] }
   0x2   :  { %v20_v1 = vld [vmem:[%s273_s1 + $0x8] sm:$0xff]  ;;  %v22_v5 = vld [vmem:[%s273_s1 + $0x18] sm:$0xff]  ;;  %v19_v7 = vld [vmem:[%s273_s1] sm:$0xff] }
   0x3   :  { %v24_v4 = vadd.f32 %v20_v1, %v16_v0  ;;  %v26_v8 = vadd.f32 %v22_v5, %v18_v2  ;;  %v23_v9 = vadd.f32 %v19_v7, %v15_v6  ;;  %v17_v10 = vld [vmem:[%s272_s0 + $0x10] sm:$0xff]  ;;  %v211_v18 = vld [vmem:[%s274_s2] sm:$0xff]  }
   0x4   :  { %v21_v11 = vld [vmem:[%s273_s1 + $0x10] sm:$0xff] }
   0x5   :  { %v28_v12 = vpack.c.bf16 %v24_v4, %v24_v4  ;;  %v25_v13 = vadd.f32 %v21_v11, %v17_v10  ;;  %v30_v14 = vpack.c.bf16 %v26_v8, %v26_v8  ;;  %v27_v15 = vpack.c.bf16 %v23_v9, %v23_v9 }
   0x7   :  { %198 = vmatprep.subr.msk.bf16.mxu0 %vm42_vm0, %v28_v12  ;;  %v29_v16 = vpack.c.bf16 %v25_v13, %v25_v13  ;;  %200 = vmatprep.subr.msk.bf16.mxu1 %vm42_vm0, %v30_v14  ;;  %v44_v17 = vsel %vm42_vm0, %v27_v15, 0 }
   0x8   :  { %70 = vmatpush1.bf16.msra.mxu0 %v44_v17 }
   0x9   :  { %v50_v19 = vsel %vm42_vm0, %v29_v16, 0 }
   0xa   :  { %113 = vmatpush1.bf16.msra.mxu1 %v50_v19 }
   0xb   :  { %199 = vmatmul.mubr.msk.bf16.vlgmr.msra.gmra.mxu0 %vm38_vm1, %v211_v18 }
   0xd   :  { %201 = vmatmul.mubr.msk.bf16.vlgmr.msra.gmra.mxu1 %vm38_vm1, %v211_v18 }
  0xcb   :  { %v89_v20 = vpop.f32.mrf.mxu0 }
  0xcc   :  { %v149_v21 = vmul.f32 0.2, %v89_v20  ;;  %vm141_vm2 = vcmp.ge.f32.partialorder %v89_v20, 0.0 }
  0xcd   :  { %v132_v22 = vpop.f32.mrf.mxu1  ;;  %v91_v24 = vpop.f32.mrf.mxu0 }
  0xce   :  { %vm143_vm3 = vcmp.ge.f32.partialorder %v132_v22, 0.0  ;;  %v151_v23 = vmul.f32 0.2, %v132_v22  ;;  %vm142_vm4 = vcmp.ge.f32.partialorder %v91_v24, 0.0  ;;  %v150_v25 = vmul.f32 0.2, %v91_v24 }
  0xcf   :  { %v134_v26 = vpop.f32.mrf.mxu1  ;;  %v93_v28 = vpop.f32.mrf.mxu0  ;;  %v157_v29 = vsel %vm141_vm2, %v89_v20, %v149_v21 }
  0xd0   :  { %vm144_vm5 = vcmp.ge.f32.partialorder %v134_v26, 0.0  ;;  %v152_v27 = vmul.f32 0.2, %v134_v26  ;;  %v159_v30 = vsel %vm143_vm3, %v132_v22, %v151_v23  ;;  %v158_v31 = vsel %vm142_vm4, %v91_v24, %v150_v25 }
  0xd1   :  { %v153_v32 = vmul.f32 0.2, %v93_v28  ;;  %v136_v33 = vpop.f32.mrf.mxu1  ;;  %v206_v34 = vpack.c.bf16 %v158_v31, %v157_v29  ;;  %vm145_vm6 = vcmp.ge.f32.partialorder %v93_v28, 0.0  ;;  %v95_v37 = vpop.f32.mrf.mxu0 }
  0xd2   :  { %v160_v35 = vsel %vm144_vm5, %v134_v26, %v152_v27  ;;  %v155_v36 = vmul.f32 0.2, %v136_v33  ;;  %vm147_vm7 = vcmp.ge.f32.partialorder %v136_v33, 0.0  ;;  %vm146_vm8 = vcmp.ge.f32.partialorder %v95_v37, 0.0 }
  0xd3   :  { %v207_v38 = vpack.c.bf16 %v160_v35, %v159_v30  ;;  %v154_v39 = vmul.f32 0.2, %v95_v37  ;;  %v138_v40 = vpop.f32.mrf.mxu1  ;;  %189 = vst [vmem:[%s275_s3] sm:$0xff] %v206_v34  ;;  %v161_v42 = vsel %vm145_vm6, %v93_v28, %v153_v32 }
  0xd4   :  { %vm148_vm9 = vcmp.ge.f32.partialorder %v138_v40, 0.0  ;;  %v156_v41 = vmul.f32 0.2, %v138_v40  ;;  %v163_v44 = vsel %vm147_vm7, %v136_v33, %v155_v36 }
  0xd5   :  { %190 = vst [vmem:[%s275_s3 + $0x8] sm:$0xff] %v207_v38  ;;  %v162_v43 = vsel %vm146_vm8, %v95_v37, %v154_v39 }
  0xd6   :  { %v208_v45 = vpack.c.bf16 %v162_v43, %v161_v42  ;;  %v164_v46 = vsel %vm148_vm9, %v138_v40, %v156_v41 }
  0xd7   :  { %v209_v47 = vpack.c.bf16 %v164_v46, %v163_v44 }
  0xd8   :  { %191 = vst [vmem:[%s275_s3 + $0x10] sm:$0xff] %v208_v45 }
  0xd9   :  { %192 = vst [vmem:[%s275_s3 + $0x18] sm:$0xff] %v209_v47 }

// kernel: _lambda_.12
= control target key start
LH: loop header
LB: loop body
LE: loop exit
PB: predicated region body
PF: predicated region fallthrough
CT: control target
= control target key end

     0   :  { %v132_v0 = vmov 0.0   ;;  %vm133_vm0 = vmmov 0   ;;  %v134_v3 = vmov 0   ;;  %vm33_vm1 = vcmask 130048   ;;  %s184_s0 = inlined_call_operand.vmem [shape: bf16[16,128], index: 0, kind: input, shape index: {}]   ;;  %s185_s1 = inlined_call_operand.vmem [shape: bf16[16,16], index: 1, kind: input, shape index: {}]   ;;  %s186_s2 = inlined_call_operand.vmem [shape: f32[16,1], index: 2, kind: input, shape index: {}]   ;;  %s187_s3 = inlined_call_operand.vmem [shape: f32[16,1], index: 3, kind: input, shape index: {}]   ;;  %s188_s4 = inlined_call_operand.vmem [shape: f32[16,128], index: 4, kind: output, shape index: {}]  }
   0x1   :  { %119 = vmatprep.subr.bf16.mxu0 %v132_v0  ;;  %v130_v1 = vld [vmem:[%s184_s0] sm:$0xff]   ;;  %121 = vmatprep.mubr.msk.bf16.mxu0 %vm133_vm0, %v132_v0  ;;  %v79_v6 = vld [vmem:[%s186_s2 + $0x8] sm:$0xff] }
   0x2   :  { %v131_v2 = vld [vmem:[%s185_s1] sm:$0xff]   ;;  %128 = vset.pattern.permute.xlu0 %v134_v3  ;;  %129 = vset.pattern.permute.xlu1 %v134_v3  ;;  %v93_v7 = vld [vmem:[%s187_s3 + $0x8] sm:$0xff] }
   0x3   :  { %120 = vmatpush3.bf16.msra.mxu0 %v130_v1  ;;  %v78_v4 = vld [vmem:[%s186_s2] sm:$0xff] }
   0x4   :  { %v92_v5 = vld [vmem:[%s187_s3] sm:$0xff]  ;;  %82 = vperm.xlu0 %128, %v78_v4  }
   0x5   :  { %96 = vperm.xlu1 %129, %v92_v5  }
   0x6   :  { %122 = vmatmul.mubr.msk.bf16.vlgmr.msra.gmra.mxu0 %vm33_vm1, %v131_v2 }
   0x8   :  { %87 = vperm.xlu0 %128, %v79_v6  }
   0x9   :  { %101 = vperm.xlu1 %129, %v93_v7  }
  0x7f   :  { %v83_v8 = vpop.permute.xlu0 %82 }
  0x80   :  { %v97_v9 = vpop.permute.xlu1 %96 }
  0x83   :  { %v88_v14 = vpop.permute.xlu0 %87 }
  0x84   :  { %v102_v18 = vpop.permute.xlu1 %101 }
  0xc6   :  { %v71_v10 = vpop.f32.mrf.mxu0 }
  0xc7   :  { %v90_v11 = vmul.f32 %v83_v8, %v71_v10 }
  0xc8   :  { %v123_v12 = vpop.f32.mrf.mxu0 }
  0xc9   :  { %v104_v13 = vadd.f32 %v97_v9, %v90_v11 }
  0xca   :  { %v74_v15 = vpop.f32.mrf.mxu0 }
  0xcb   :  { %v106_v16 = vmax.f32 %v104_v13, 0.0  ;;  %v91_v17 = vmul.f32 %v88_v14, %v74_v15 }
  0xcc   :  { %v124_v19 = vpop.f32.mrf.mxu0 }
  0xcd   :  { %108 = vst [vmem:[%s188_s4] sm:$0xff] %v106_v16  ;;  %v105_v20 = vadd.f32 %v102_v18, %v91_v17 }
  0xcf   :  { %v107_v21 = vmax.f32 %v105_v20, 0.0 }
  0xd1   :  { %109 = vst [vmem:[%s188_s4 + $0x8] sm:$0xff] %v107_v21 }

// kernel: reverse.4
= control target key start
LH: loop header
LB: loop body
LE: loop exit
PB: predicated region body
PF: predicated region fallthrough
CT: control target
= control target key end

     0   :  { %s80_s0 = inlined_call_operand.vmem [shape: f32[16,2,8,3], index: 0, kind: input, shape index: {}]   ;;  %s81_s1 = inlined_call_operand.vmem [shape: f32[16,2,8,3], index: 1, kind: output, shape index: {}]  }
   0x1   :  { %v24_v0 = vld [vmem:[%s80_s0 + $0x10] sm:$0xff]  ;;  %v25_v1 = vld [vmem:[%s80_s0 + $0x28] sm:$0xff]  ;;  %v29_v3 = vld [vmem:[%s80_s0 + $0x20] sm:$0xff] }
   0x2   :  { %v27_v2 = vld [vmem:[%s80_s0 + $0x8] sm:$0xff]  ;;  %4 = vst [vmem:[%s81_s1] sm:$0xff] %v24_v0  ;;  %26 = vst [vmem:[%s81_s1 + $0x18] sm:$0xff] %v25_v1  ;;  %v17_v4 = vld [vmem:[%s80_s0] sm:$0xff] }
   0x3   :  { %28 = vst [vmem:[%s81_s1 + $0x8] sm:$0xff] %v27_v2  ;;  %v32_v5 = vld [vmem:[%s80_s0 + $0x18] sm:$0xff]  ;;  %30 = vst [vmem:[%s81_s1 + $0x20] sm:$0xff] %v29_v3 }
   0x4   :  { %31 = vst [vmem:[%s81_s1 + $0x10] sm:$0xff] %v17_v4  ;;  %33 = vst [vmem:[%s81_s1 + $0x28] sm:$0xff] %v32_v5 }

// kernel: _lambda_.13
= control target key start
LH: loop header
LB: loop body
LE: loop exit
PB: predicated region body
PF: predicated region fallthrough
CT: control target
= control target key end

     0   :  { %v203_v1 = vmov 0   ;;  %vm50_vm0 = vcmask 261120   ;;  %s284_s0 = inlined_call_operand.vmem [shape: bf16[32,128], index: 0, kind: input, shape index: {}]   ;;  %s285_s1 = inlined_call_operand.vmem [shape: bf16[32,32], index: 1, kind: input, shape index: {}]   ;;  %s286_s2 = inlined_call_operand.vmem [shape: f32[32,1], index: 2, kind: input, shape index: {}]   ;;  %s287_s3 = inlined_call_operand.vmem [shape: f32[32,1], index: 3, kind: input, shape index: {}]   ;;  %s288_s5 = inlined_call_operand.vmem [shape: f32[16,128], index: 5, kind: output, shape index: {1}]   ;;  %s289_s4 = inlined_call_operand.vmem [shape: f32[16,128], index: 4, kind: output, shape index: {0}]  }
   0x1   :  { %v199_v0 = vld [vmem:[%s284_s0 + $0x8] sm:$0xff]   ;;  %198 = vset.pattern.permute.xlu1 %v203_v1  ;;  %197 = vset.pattern.permute.xlu0 %v203_v1  ;;  %v200_v2 = vld [vmem:[%s284_s0] sm:$0xff]   ;;  %v108_v4 = vld [vmem:[%s286_s2 + $0x10] sm:$0xff] }
   0x2   :  { %188 = vmatprep.subr.bf16.mxu0 %v199_v0  ;;  %v201_v3 = vld [vmem:[%s285_s1] sm:$0xff]   ;;  %122 = vperm.xlu1 %198, %v108_v4   ;;  %v202_v6 = vld [vmem:[%s285_s1 + $0x8] sm:$0xff]   ;;  %v109_v7 = vld [vmem:[%s286_s2 + $0x18] sm:$0xff] }
   0x3   :  { %189 = vmatpush3.bf16.msra.mxu0 %v199_v0  ;;  %192 = vmatprep.mubr.msk.bf16.mxu0 %vm50_vm0, %v201_v3  ;;  %v106_v5 = vld [vmem:[%s286_s2] sm:$0xff]  ;;  %v107_v8 = vld [vmem:[%s286_s2 + $0x8] sm:$0xff]  ;;  %v137_v11 = vld [vmem:[%s287_s3 + $0x18] sm:$0xff] }
   0x4   :  { %190 = vmatprep.subr.bf16.mxu0 %v200_v2  ;;  %112 = vperm.xlu0 %197, %v106_v5   ;;  %v135_v9 = vld [vmem:[%s287_s3 + $0x8] sm:$0xff]  ;;  %v134_v10 = vld [vmem:[%s287_s3] sm:$0xff]  ;;  %v136_v12 = vld [vmem:[%s287_s3 + $0x10] sm:$0xff] }
   0x6   :  { %127 = vperm.xlu1 %198, %v109_v7  }
   0x7   :  { %191 = vmatpush3.bf16.msra.mxu0 %v200_v2 }
   0x8   :  { %117 = vperm.xlu0 %197, %v107_v8  }
   0xa   :  { %193 = vmatmul.mubr.msk.bf16.vlgmr.msra.gmra.mxu0 %vm50_vm0, %v202_v6  ;;  %145 = vperm.xlu1 %198, %v135_v9  }
   0xc   :  { %140 = vperm.xlu0 %197, %v134_v10  }
   0xe   :  { %155 = vperm.xlu1 %198, %v137_v11  }
  0x10   :  { %150 = vperm.xlu0 %197, %v136_v12  }
  0x7d   :  { %v123_v14 = vpop.permute.xlu1 %122 }
  0x7f   :  { %v113_v13 = vpop.permute.xlu0 %112 }
  0x81   :  { %v128_v16 = vpop.permute.xlu1 %127 }
  0x83   :  { %v118_v15 = vpop.permute.xlu0 %117 }
  0x85   :  { %v146_v18 = vpop.permute.xlu1 %145 }
  0x87   :  { %v141_v17 = vpop.permute.xlu0 %140 }
  0x89   :  { %v156_v29 = vpop.permute.xlu1 %155 }
  0x8b   :  { %v151_v21 = vpop.permute.xlu0 %150 }
  0xca   :  { %v194_v19 = vpop.f32.mrf.mxu0 }
  0xcb   :  { %v132_v20 = vmul.f32 %v194_v19, %v123_v14 }
  0xcc   :  { %v91_v22 = vpop.f32.mrf.mxu0 }
  0xcd   :  { %v160_v23 = vadd.f32 %v151_v21, %v132_v20  ;;  %v130_v24 = vmul.f32 %v113_v13, %v91_v22 }
  0xce   :  { %v195_v25 = vpop.f32.mrf.mxu0 }
  0xcf   :  { %v164_v26 = vmax.f32 %v160_v23, 0.0  ;;  %v158_v27 = vadd.f32 %v141_v17, %v130_v24  ;;  %v133_v28 = vmul.f32 %v195_v25, %v128_v16 }
  0xd0   :  { %v94_v30 = vpop.f32.mrf.mxu0 }
  0xd1   :  { %168 = vst [vmem:[%s288_s5] sm:$0xff] %v164_v26  ;;  %v162_v31 = vmax.f32 %v158_v27, 0.0  ;;  %v161_v32 = vadd.f32 %v156_v29, %v133_v28  ;;  %v131_v33 = vmul.f32 %v118_v15, %v94_v30 }
  0xd3   :  { %166 = vst [vmem:[%s289_s4] sm:$0xff] %v162_v31  ;;  %v165_v34 = vmax.f32 %v161_v32, 0.0  ;;  %v159_v35 = vadd.f32 %v146_v18, %v131_v33 }
  0xd5   :  { %169 = vst [vmem:[%s288_s5 + $0x8] sm:$0xff] %v165_v34  ;;  %v163_v36 = vmax.f32 %v159_v35, 0.0 }
  0xd7   :  { %167 = vst [vmem:[%s289_s4 + $0x8] sm:$0xff] %v163_v36 }

// kernel: _lambda_.14
= control target key start
LH: loop header
LB: loop body
LE: loop exit
PB: predicated region body
PF: predicated region fallthrough
CT: control target
= control target key end

     0   :  { %vm36_vm0 = vcmask 130048   ;;  %s206_s0 = inlined_call_operand.vmem [shape: f32[16,128], index: 0, kind: input, shape index: {}]   ;;  %s207_s1 = inlined_call_operand.vmem [shape: f32[16,128], index: 1, kind: input, shape index: {}]   ;;  %s208_s2 = inlined_call_operand.vmem [shape: bf16[32,16], index: 2, kind: input, shape index: {}]   ;;  %s209_s3 = inlined_call_operand.vmem [shape: bf16[32,128], index: 3, kind: output, shape index: {}]  }
   0x1   :  { %v15_v0 = vld [vmem:[%s206_s0] sm:$0xff]  ;;  %v16_v1 = vld [vmem:[%s206_s0 + $0x8] sm:$0xff] }
   0x2   :  { %v17_v2 = vld [vmem:[%s207_s1] sm:$0xff]  ;;  %v18_v3 = vld [vmem:[%s207_s1 + $0x8] sm:$0xff] }
   0x3   :  { %v19_v4 = vadd.f32 %v17_v2, %v15_v0  ;;  %v20_v5 = vadd.f32 %v18_v3, %v16_v1  ;;  %v160_v6 = vld [vmem:[%s208_s2] sm:$0xff]   ;;  %v161_v8 = vld [vmem:[%s208_s2 + $0x8] sm:$0xff]  }
   0x4   :  { %156 = vmatprep.mubr.msk.bf16.mxu0 %vm36_vm0, %v160_v6 }
   0x5   :  { %v21_v7 = vpack.c.bf16 %v20_v5, %v19_v4 }
   0x7   :  { %154 = vmatprep.subr.bf16.mxu0 %v21_v7 }
   0x8   :  { %155 = vmatpush3.bf16.msra.mxu0 %v21_v7 }
   0xb   :  { %157 = vmatmul.mubr.msk.bf16.vlgmr.msra.gmra.mxu0 %vm36_vm0, %v161_v8 }
  0xcb   :  { %v158_v9 = vpop.f32.mrf.mxu0 }
  0xcc   :  { %v98_v11 = vmul.f32 0.2, %v158_v9  ;;  %vm94_vm1 = vcmp.ge.f32.partialorder %v158_v9, 0.0 }
  0xcd   :  { %v77_v10 = vpop.f32.mrf.mxu0 }
  0xce   :  { %v96_v13 = vmul.f32 0.2, %v77_v10  ;;  %vm92_vm3 = vcmp.ge.f32.partialorder %v77_v10, 0.0  ;;  %v102_v16 = vsel %vm94_vm1, %v158_v9, %v98_v11 }
  0xcf   :  { %v159_v12 = vpop.f32.mrf.mxu0 }
  0xd0   :  { %vm95_vm2 = vcmp.ge.f32.partialorder %v159_v12, 0.0  ;;  %v99_v14 = vmul.f32 0.2, %v159_v12  ;;  %v100_v20 = vsel %vm92_vm3, %v77_v10, %v96_v13 }
  0xd1   :  { %v80_v15 = vpop.f32.mrf.mxu0 }
  0xd2   :  { %v103_v17 = vsel %vm95_vm2, %v159_v12, %v99_v14  ;;  %vm93_vm4 = vcmp.ge.f32.partialorder %v80_v15, 0.0  ;;  %v97_v18 = vmul.f32 0.2, %v80_v15 }
  0xd3   :  { %v148_v19 = vpack.c.bf16 %v103_v17, %v102_v16 }
  0xd4   :  { %v101_v21 = vsel %vm93_vm4, %v80_v15, %v97_v18 }
  0xd5   :  { %v143_v22 = vpack.c.bf16 %v101_v21, %v100_v20  ;;  %150 = vst [vmem:[%s209_s3 + $0x8] sm:$0xff] %v148_v19  }
  0xd7   :  { %144 = vst [vmem:[%s209_s3] sm:$0xff] %v143_v22  }

// kernel: _lambda_.15
= control target key start
LH: loop header
LB: loop body
LE: loop exit
PB: predicated region body
PF: predicated region fallthrough
CT: control target
= control target key end

     0   :  { %v197_v1 = vmov 0   ;;  %vm48_vm0 = vcmask 261120   ;;  %s277_s0 = inlined_call_operand.vmem [shape: bf16[32,32], index: 0, kind: input, shape index: {}]   ;;  %s278_s1 = inlined_call_operand.vmem [shape: bf16[32,32], index: 1, kind: input, shape index: {}]   ;;  %s279_s2 = inlined_call_operand.vmem [shape: f32[32,1], index: 2, kind: input, shape index: {}]   ;;  %s280_s3 = inlined_call_operand.vmem [shape: f32[32,1], index: 3, kind: input, shape index: {}]   ;;  %s281_s4 = inlined_call_operand.vmem [shape: f32[32,32], index: 4, kind: output, shape index: {}]  }
   0x1   :  { %v193_v0 = vld [vmem:[%s277_s0 + $0x8] sm:$0xff]   ;;  %192 = vset.pattern.permute.xlu1 %v197_v1  ;;  %191 = vset.pattern.permute.xlu0 %v197_v1  ;;  %v194_v2 = vld [vmem:[%s277_s0] sm:$0xff]   ;;  %v106_v4 = vld [vmem:[%s279_s2 + $0x10] sm:$0xff] }
   0x2   :  { %182 = vmatprep.subr.bf16.mxu0 %v193_v0  ;;  %v195_v3 = vld [vmem:[%s278_s1] sm:$0xff]   ;;  %120 = vperm.xlu1 %192, %v106_v4   ;;  %v196_v6 = vld [vmem:[%s278_s1 + $0x8] sm:$0xff]   ;;  %v107_v7 = vld [vmem:[%s279_s2 + $0x18] sm:$0xff] }
   0x3   :  { %183 = vmatpush3.bf16.msra.mxu0 %v193_v0  ;;  %186 = vmatprep.mubr.msk.bf16.mxu0 %vm48_vm0, %v195_v3  ;;  %v104_v5 = vld [vmem:[%s279_s2] sm:$0xff]  ;;  %v105_v8 = vld [vmem:[%s279_s2 + $0x8] sm:$0xff]  ;;  %v135_v11 = vld [vmem:[%s280_s3 + $0x18] sm:$0xff] }
   0x4   :  { %184 = vmatprep.subr.bf16.mxu0 %v194_v2  ;;  %110 = vperm.xlu0 %191, %v104_v5   ;;  %v133_v9 = vld [vmem:[%s280_s3 + $0x8] sm:$0xff]  ;;  %v132_v10 = vld [vmem:[%s280_s3] sm:$0xff]  ;;  %v134_v12 = vld [vmem:[%s280_s3 + $0x10] sm:$0xff] }
   0x6   :  { %125 = vperm.xlu1 %192, %v107_v7  }
   0x7   :  { %185 = vmatpush3.bf16.msra.mxu0 %v194_v2 }
   0x8   :  { %115 = vperm.xlu0 %191, %v105_v8  }
   0xa   :  { %187 = vmatmul.mubr.msk.bf16.vlgmr.msra.gmra.mxu0 %vm48_vm0, %v196_v6  ;;  %143 = vperm.xlu1 %192, %v133_v9  }
   0xc   :  { %138 = vperm.xlu0 %191, %v132_v10  }
   0xe   :  { %153 = vperm.xlu1 %192, %v135_v11  }
  0x10   :  { %148 = vperm.xlu0 %191, %v134_v12  }
  0x7d   :  { %v121_v14 = vpop.permute.xlu1 %120 }
  0x7f   :  { %v111_v13 = vpop.permute.xlu0 %110 }
  0x81   :  { %v126_v16 = vpop.permute.xlu1 %125 }
  0x83   :  { %v116_v15 = vpop.permute.xlu0 %115 }
  0x85   :  { %v144_v18 = vpop.permute.xlu1 %143 }
  0x87   :  { %v139_v17 = vpop.permute.xlu0 %138 }
  0x89   :  { %v154_v29 = vpop.permute.xlu1 %153 }
  0x8b   :  { %v149_v21 = vpop.permute.xlu0 %148 }
  0xca   :  { %v188_v19 = vpop.f32.mrf.mxu0 }
  0xcb   :  { %v130_v20 = vmul.f32 %v188_v19, %v121_v14 }
  0xcc   :  { %v89_v22 = vpop.f32.mrf.mxu0 }
  0xcd   :  { %v158_v23 = vadd.f32 %v149_v21, %v130_v20  ;;  %v128_v24 = vmul.f32 %v111_v13, %v89_v22 }
  0xce   :  { %v189_v25 = vpop.f32.mrf.mxu0 }
  0xcf   :  { %v162_v26 = vmax.f32 %v158_v23, 0.0  ;;  %v156_v27 = vadd.f32 %v139_v17, %v128_v24  ;;  %v131_v28 = vmul.f32 %v189_v25, %v126_v16 }
  0xd0   :  { %v92_v30 = vpop.f32.mrf.mxu0 }
  0xd1   :  { %166 = vst.msk [vmem:[%s281_s4 + $0x10] sm:$0xff] %vm48_vm0, %v162_v26  ;;  %v160_v31 = vmax.f32 %v156_v27, 0.0  ;;  %v159_v32 = vadd.f32 %v154_v29, %v131_v28  ;;  %v129_v33 = vmul.f32 %v116_v15, %v92_v30 }
  0xd3   :  { %164 = vst.msk [vmem:[%s281_s4] sm:$0xff] %vm48_vm0, %v160_v31  ;;  %v163_v34 = vmax.f32 %v159_v32, 0.0  ;;  %v157_v35 = vadd.f32 %v144_v18, %v129_v33 }
  0xd5   :  { %167 = vst.msk [vmem:[%s281_s4 + $0x18] sm:$0xff] %vm48_vm0, %v163_v34  ;;  %v161_v36 = vmax.f32 %v157_v35, 0.0 }
  0xd7   :  { %165 = vst.msk [vmem:[%s281_s4 + $0x8] sm:$0xff] %vm48_vm0, %v161_v36 }

// kernel: _lambda_.16
= control target key start
LH: loop header
LB: loop body
LE: loop exit
PB: predicated region body
PF: predicated region fallthrough
CT: control target
= control target key end

     0   :  { %v349_v1 = vmov 0   ;;  %vm80_vm0 = vcmask 523264   ;;  %s480_s0 = inlined_call_operand.vmem [shape: bf16[64,128], index: 0, kind: input, shape index: {}]   ;;  %s481_s1 = inlined_call_operand.vmem [shape: bf16[64,64], index: 1, kind: input, shape index: {}]   ;;  %s482_s2 = inlined_call_operand.vmem [shape: f32[64,1], index: 2, kind: input, shape index: {}]   ;;  %s483_s3 = inlined_call_operand.vmem [shape: f32[64,1], index: 3, kind: input, shape index: {}]   ;;  %s484_s4 = inlined_call_operand.vmem [shape: f32[32,128], index: 4, kind: output, shape index: {0}]   ;;  %s485_s5 = inlined_call_operand.vmem [shape: f32[32,128], index: 5, kind: output, shape index: {1}]  }
   0x1   :  { %v341_v0 = vld [vmem:[%s480_s0 + $0x18] sm:$0xff]   ;;  %340 = vset.pattern.permute.xlu1 %v349_v1  ;;  %339 = vset.pattern.permute.xlu0 %v349_v1  ;;  %v342_v2 = vld [vmem:[%s480_s0 + $0x10] sm:$0xff]   ;;  %v343_v3 = vld [vmem:[%s480_s0 + $0x8] sm:$0xff]  }
   0x2   :  { %314 = vmatprep.subr.bf16.mxu0 %v341_v0  ;;  %330 = vmatprep.subr.bf16.mxu1 %v341_v0  ;;  %v345_v4 = vld [vmem:[%s481_s1] sm:$0xff]   ;;  %v346_v5 = vld [vmem:[%s481_s1 + $0x10] sm:$0xff]   ;;  %v161_v9 = vld [vmem:[%s482_s2 + $0x18] sm:$0xff] }
   0x3   :  { %315 = vmatpush3.bf16.msra.mxu0 %v341_v0  ;;  %334 = vmatpush3.bf16.msra.mxu1 %v341_v0  ;;  %v344_v6 = vld [vmem:[%s480_s0] sm:$0xff]   ;;  %v160_v7 = vld [vmem:[%s482_s2 + $0x10] sm:$0xff]  ;;  %v159_v10 = vld [vmem:[%s482_s2 + $0x8] sm:$0xff] }
   0x4   :  { %316 = vmatprep.subr.bf16.mxu0 %v342_v2  ;;  %331 = vmatprep.subr.bf16.mxu1 %v342_v2  ;;  %v158_v8 = vld [vmem:[%s482_s2] sm:$0xff]  ;;  %v347_v11 = vld [vmem:[%s481_s1 + $0x8] sm:$0xff]   ;;  %v348_v12 = vld [vmem:[%s481_s1 + $0x18] sm:$0xff]  }
   0x5   :  { %322 = vmatprep.mubr.msk.bf16.mxu0 %vm80_vm0, %v345_v4  ;;  %326 = vmatprep.mubr.msk.bf16.mxu1 %vm80_vm0, %v346_v5  ;;  %v163_v13 = vld [vmem:[%s482_s2 + $0x28] sm:$0xff]  ;;  %v162_v14 = vld [vmem:[%s482_s2 + $0x20] sm:$0xff]  ;;  %v165_v15 = vld [vmem:[%s482_s2 + $0x38] sm:$0xff] }
   0x6   :  { %178 = vperm.xlu1 %340, %v160_v7   ;;  %168 = vperm.xlu0 %339, %v158_v8   ;;  %v164_v16 = vld [vmem:[%s482_s2 + $0x30] sm:$0xff]  ;;  %v215_v17 = vld [vmem:[%s483_s3 + $0x8] sm:$0xff]  ;;  %v214_v18 = vld [vmem:[%s483_s3] sm:$0xff] }
   0x7   :  { %317 = vmatpush3.bf16.msra.mxu0 %v342_v2  ;;  %335 = vmatpush3.bf16.msra.mxu1 %v342_v2  ;;  %v217_v19 = vld [vmem:[%s483_s3 + $0x18] sm:$0xff]  ;;  %v216_v20 = vld [vmem:[%s483_s3 + $0x10] sm:$0xff]  ;;  %v219_v21 = vld [vmem:[%s483_s3 + $0x28] sm:$0xff] }
   0x8   :  { %318 = vmatprep.subr.bf16.mxu0 %v343_v3  ;;  %332 = vmatprep.subr.bf16.mxu1 %v343_v3  ;;  %v218_v22 = vld [vmem:[%s483_s3 + $0x20] sm:$0xff]  ;;  %v221_v23 = vld [vmem:[%s483_s3 + $0x38] sm:$0xff]  ;;  %v220_v24 = vld [vmem:[%s483_s3 + $0x30] sm:$0xff] }
   0xa   :  { %183 = vperm.xlu1 %340, %v161_v9   ;;  %173 = vperm.xlu0 %339, %v159_v10  }
   0xb   :  { %319 = vmatpush3.bf16.msra.mxu0 %v343_v3  ;;  %336 = vmatpush3.bf16.msra.mxu1 %v343_v3 }
   0xc   :  { %320 = vmatprep.subr.bf16.mxu0 %v344_v6  ;;  %333 = vmatprep.subr.bf16.mxu1 %v344_v6 }
   0xe   :  { %193 = vperm.xlu1 %340, %v163_v13   ;;  %188 = vperm.xlu0 %339, %v162_v14  }
   0xf   :  { %321 = vmatpush3.bf16.msra.mxu0 %v344_v6  ;;  %337 = vmatpush3.bf16.msra.mxu1 %v344_v6 }
  0x12   :  { %323 = vmatmul.mubr.msk.bf16.vlgmr.msra.gmra.mxu0 %vm80_vm0, %v347_v11  ;;  %327 = vmatmul.mubr.msk.bf16.vlgmr.msra.gmra.mxu1 %vm80_vm0, %v348_v12 }
  0x13   :  { %203 = vperm.xlu1 %340, %v165_v15   ;;  %198 = vperm.xlu0 %339, %v164_v16  }
  0x17   :  { %229 = vperm.xlu1 %340, %v215_v17   ;;  %224 = vperm.xlu0 %339, %v214_v18  }
  0x1b   :  { %239 = vperm.xlu1 %340, %v217_v19   ;;  %234 = vperm.xlu0 %339, %v216_v20  }
  0x1f   :  { %249 = vperm.xlu1 %340, %v219_v21   ;;  %244 = vperm.xlu0 %339, %v218_v22  }
  0x23   :  { %259 = vperm.xlu1 %340, %v221_v23   ;;  %254 = vperm.xlu0 %339, %v220_v24  }
  0x81   :  { %v169_v25 = vpop.permute.xlu0 %168  ;;  %v179_v26 = vpop.permute.xlu1 %178 }
  0x85   :  { %v174_v27 = vpop.permute.xlu0 %173  ;;  %v184_v28 = vpop.permute.xlu1 %183 }
  0x89   :  { %v189_v29 = vpop.permute.xlu0 %188  ;;  %v194_v30 = vpop.permute.xlu1 %193 }
  0x8e   :  { %v199_v31 = vpop.permute.xlu0 %198  ;;  %v204_v32 = vpop.permute.xlu1 %203 }
  0x92   :  { %v225_v33 = vpop.permute.xlu0 %224  ;;  %v230_v34 = vpop.permute.xlu1 %229 }
  0x96   :  { %v235_v35 = vpop.permute.xlu0 %234  ;;  %v240_v36 = vpop.permute.xlu1 %239 }
  0x9a   :  { %v245_v37 = vpop.permute.xlu0 %244  ;;  %v250_v40 = vpop.permute.xlu1 %249 }
  0x9e   :  { %v255_v41 = vpop.permute.xlu0 %254  ;;  %v260_v60 = vpop.permute.xlu1 %259 }
  0xd2   :  { %v324_v38 = vpop.f32.mrf.mxu0  ;;  %v328_v39 = vpop.f32.mrf.mxu1 }
  0xd3   :  { %v208_v42 = vmul.f32 %v324_v38, %v179_v26  ;;  %v212_v43 = vmul.f32 %v328_v39, %v199_v31 }
  0xd4   :  { %v127_v44 = vpop.f32.mrf.mxu0  ;;  %v143_v45 = vpop.f32.mrf.mxu1 }
  0xd5   :  { %v264_v46 = vadd.f32 %v235_v35, %v208_v42  ;;  %v268_v47 = vadd.f32 %v255_v41, %v212_v43  ;;  %v206_v48 = vmul.f32 %v169_v25, %v127_v44  ;;  %v210_v49 = vmul.f32 %v189_v29, %v143_v45 }
  0xd6   :  { %v325_v50 = vpop.f32.mrf.mxu0  ;;  %v329_v51 = vpop.f32.mrf.mxu1 }
  0xd7   :  { %v272_v52 = vmax.f32 %v264_v46, 0.0  ;;  %v276_v53 = vmax.f32 %v268_v47, 0.0  ;;  %v262_v54 = vadd.f32 %v225_v33, %v206_v48  ;;  %v266_v55 = vadd.f32 %v245_v37, %v210_v49 }
  0xd8   :  { %v209_v56 = vmul.f32 %v325_v50, %v184_v28  ;;  %v213_v57 = vmul.f32 %v329_v51, %v204_v32  ;;  %v130_v58 = vpop.f32.mrf.mxu0  ;;  %v146_v59 = vpop.f32.mrf.mxu1 }
  0xd9   :  { %280 = vst [vmem:[%s484_s4 + $0x10] sm:$0xff] %v272_v52  ;;  %284 = vst [vmem:[%s485_s5 + $0x10] sm:$0xff] %v276_v53  ;;  %v270_v61 = vmax.f32 %v262_v54, 0.0  ;;  %v274_v62 = vmax.f32 %v266_v55, 0.0  ;;  %v207_v63 = vmul.f32 %v174_v27, %v130_v58  ;;  %v211_v0 = vmul.f32 %v194_v30, %v146_v59 }
  0xda   :  { %v265_v1 = vadd.f32 %v240_v36, %v209_v56  ;;  %v269_v2 = vadd.f32 %v260_v60, %v213_v57 }
  0xdb   :  { %278 = vst [vmem:[%s484_s4] sm:$0xff] %v270_v61  ;;  %282 = vst [vmem:[%s485_s5] sm:$0xff] %v274_v62  ;;  %v263_v3 = vadd.f32 %v230_v34, %v207_v63  ;;  %v267_v4 = vadd.f32 %v250_v40, %v211_v0 }
  0xdc   :  { %v273_v5 = vmax.f32 %v265_v1, 0.0  ;;  %v277_v6 = vmax.f32 %v269_v2, 0.0 }
  0xdd   :  { %v271_v7 = vmax.f32 %v263_v3, 0.0  ;;  %v275_v8 = vmax.f32 %v267_v4, 0.0 }
  0xde   :  { %281 = vst [vmem:[%s484_s4 + $0x18] sm:$0xff] %v273_v5  ;;  %285 = vst [vmem:[%s485_s5 + $0x18] sm:$0xff] %v277_v6 }
  0xdf   :  { %279 = vst [vmem:[%s484_s4 + $0x8] sm:$0xff] %v271_v7  ;;  %283 = vst [vmem:[%s485_s5 + $0x8] sm:$0xff] %v275_v8 }

// kernel: _lambda_.17
= control target key start
LH: loop header
LB: loop body
LE: loop exit
PB: predicated region body
PF: predicated region fallthrough
CT: control target
= control target key end

     0   :  { %vm65_vm0 = vcmask 261120   ;;  %v284_v18 = vmov 0.0   ;;  %vm285_vm1 = vmmov 0   ;;  %v286_v19 = vmov 0   ;;  %s366_s0 = inlined_call_operand.vmem [shape: f32[32,32], index: 0, kind: input, shape index: {}]   ;;  %s367_s1 = inlined_call_operand.vmem [shape: f32[32,32], index: 1, kind: input, shape index: {}]   ;;  %s368_s2 = inlined_call_operand.vmem [shape: bf16[64,32], index: 2, kind: input, shape index: {}]   ;;  %s369_s4 = inlined_call_operand.<no memory space> [shape: f32[1,1], index: 4, kind: input, shape index: {}]   ;;  %s370_s3 = inlined_call_operand.vmem [shape: bf16[1,64], index: 3, kind: input, shape index: {}]   ;;  %s371_s5 = inlined_call_operand.vmem [shape: f32[1,32], index: 5, kind: output, shape index: {}]  }
   0x1   :  { %v25_v0 = vld [vmem:[%s366_s0 + $0x10] sm:$0xff]  ;;  %v26_v1 = vld [vmem:[%s366_s0 + $0x18] sm:$0xff]  ;;  %v23_v5 = vld [vmem:[%s366_s0] sm:$0xff]  ;;  %264 = vmatprep.subr.bf16.mxu1 %v284_v18  ;;  %272 = vmatprep.mubr.msk.bf16.mxu1 %vm285_vm1, %v284_v18  ;;  %v10_v20 = vstv %s369_s4  ;;  %vm182_vm10 = vcmask 523264   ;;  %v178_v51 = vlaneseq  ;;  %vm226_vm11 = vcmask 253952  }
   0x2   :  { %v29_v2 = vld [vmem:[%s367_s1 + $0x10] sm:$0xff]  ;;  %v30_v3 = vld [vmem:[%s367_s1 + $0x18] sm:$0xff]  ;;  %v24_v6 = vld [vmem:[%s366_s0 + $0x8] sm:$0xff]  ;;  %279 = vset.pattern.permute.xlu0 %v286_v19  ;;  %11 = vst [vmem:[#allocation2] sm:$0x1] %v10_v20 }
   0x3   :  { %v33_v4 = vadd.f32 %v29_v2, %v25_v0  ;;  %v34_v7 = vadd.f32 %v30_v3, %v26_v1  ;;  %v27_v8 = vld [vmem:[%s367_s1] sm:$0xff]  ;;  %v28_v9 = vld [vmem:[%s367_s1 + $0x8] sm:$0xff]  ;;  %v282_v16 = vld [vmem:[%s368_s2 + $0x10] sm:$0xff]   ;;  %v179_v52 = vshrl.u32 %v178_v51, 7 }
   0x4   :  { %v31_v10 = vadd.f32 %v27_v8, %v23_v5  ;;  %v32_v11 = vadd.f32 %v28_v9, %v24_v6  ;;  %v280_v12 = vld [vmem:[%s368_s2] sm:$0xff]   ;;  %v281_v15 = vld [vmem:[%s368_s2 + $0x8] sm:$0xff]   ;;  %v283_v17 = vld [vmem:[%s368_s2 + $0x18] sm:$0xff]  }
   0x5   :  { %v36_v13 = vpack.c.bf16 %v34_v7, %v33_v4  ;;  %256 = vmatprep.mubr.msk.bf16.mxu0 %vm65_vm0, %v280_v12  ;;  %v167_v50 = vld [vmem:[%s370_s3] sm:$0x1]  ;;  %v180_v53 = vsub.s32 0, %v179_v52 }
   0x6   :  { %v35_v14 = vpack.c.bf16 %v32_v11, %v31_v10 }
   0x7   :  { %252 = vmatprep.subr.bf16.mxu0 %v36_v13 }
   0x8   :  { %253 = vmatpush3.bf16.msra.mxu0 %v36_v13 }
   0x9   :  { %254 = vmatprep.subr.bf16.mxu0 %v35_v14  ;;  %v172_v21 = vld [vmem:[#allocation2] sm:$0x1] }
   0xa   :  { %175 = vperm.xlu0 %279, %v172_v21  }
   0xc   :  { %255 = vmatpush3.bf16.msra.mxu0 %v35_v14 }
   0xf   :  { %257 = vmatmul.mubr.msk.bf16.vlgmr.msra.gmra.mxu0 %vm65_vm0, %v281_v15 }
  0x10   :  { %260 = vmatprep.mubr.msk.bf16.mxu0 %vm65_vm0, %v282_v16 }
  0x17   :  { %261 = vmatmul.mubr.msk.bf16.gmra.mxu0 %vm65_vm0, %v283_v17 }
  0x85   :  { %v176_v54 = vpop.permute.xlu0 %175 }
  0x86   :  { %v181_v55 = vrot.slane %v176_v54, %v180_v53 }
  0xcf   :  { %v258_v22 = vpop.f32.mrf.mxu0 }
  0xd0   :  { %v153_v39 = vmul.f32 0.2, %v258_v22  ;;  %vm145_vm7 = vcmp.ge.f32.partialorder %v258_v22, 0.0 }
  0xd1   :  { %v112_v23 = vpop.f32.mrf.mxu0 }
  0xd2   :  { %v161_v44 = vsel %vm145_vm7, %v258_v22, %v153_v39  ;;  %v151_v45 = vmul.f32 0.2, %v112_v23  ;;  %vm143_vm9 = vcmp.ge.f32.partialorder %v112_v23, 0.0 }
  0xd3   :  { %v259_v24 = vpop.f32.mrf.mxu0 }
  0xd4   :  { %v154_v37 = vmul.f32 0.2, %v259_v24  ;;  %vm146_vm6 = vcmp.ge.f32.partialorder %v259_v24, 0.0  ;;  %v159_v48 = vsel %vm143_vm9, %v112_v23, %v151_v45 }
  0xd5   :  { %v115_v25 = vpop.f32.mrf.mxu0 }
  0xd6   :  { %v162_v42 = vsel %vm146_vm6, %v259_v24, %v154_v37  ;;  %v152_v43 = vmul.f32 0.2, %v115_v25  ;;  %vm144_vm8 = vcmp.ge.f32.partialorder %v115_v25, 0.0 }
  0xd7   :  { %v262_v26 = vpop.f32.mrf.mxu0  ;;  %v169_v46 = vpack.c.bf16 %v162_v42, %v161_v44 }
  0xd8   :  { %v157_v28 = vmul.f32 0.2, %v262_v26  ;;  %vm149_vm2 = vcmp.ge.f32.partialorder %v262_v26, 0.0  ;;  %v160_v47 = vsel %vm144_vm8, %v115_v25, %v152_v43 }
  0xd9   :  { %v128_v27 = vpop.f32.mrf.mxu0  ;;  %v168_v49 = vpack.c.bf16 %v160_v47, %v159_v48 }
  0xda   :  { %v155_v31 = vmul.f32 0.2, %v128_v27  ;;  %v165_v34 = vsel %vm149_vm2, %v262_v26, %v157_v28  ;;  %vm147_vm5 = vcmp.ge.f32.partialorder %v128_v27, 0.0 }
  0xdb   :  { %v263_v29 = vpop.f32.mrf.mxu0 }
  0xdc   :  { %vm150_vm3 = vcmp.ge.f32.partialorder %v263_v29, 0.0  ;;  %v158_v30 = vmul.f32 0.2, %v263_v29  ;;  %v163_v40 = vsel %vm147_vm5, %v128_v27, %v155_v31 }
  0xdd   :  { %v131_v32 = vpop.f32.mrf.mxu0 }
  0xde   :  { %vm148_vm4 = vcmp.ge.f32.partialorder %v131_v32, 0.0  ;;  %v156_v33 = vmul.f32 0.2, %v131_v32  ;;  %v166_v35 = vsel %vm150_vm3, %v263_v29, %v158_v30 }
  0xdf   :  { %v171_v36 = vpack.c.bf16 %v166_v35, %v165_v34 }
  0xe0   :  { %v164_v38 = vsel %vm148_vm4, %v131_v32, %v156_v33 }
  0xe1   :  { %265 = vmatpush3.bf16.msra.mxu1 %v171_v36  ;;  %v170_v41 = vpack.c.bf16 %v164_v38, %v163_v40 }
  0xe2   :  { %266 = vmatprep.subr.bf16.mxu1 %v284_v18 }
  0xe5   :  { %267 = vmatpush3.bf16.msra.mxu1 %v170_v41 }
  0xe6   :  { %268 = vmatprep.subr.bf16.mxu1 %v284_v18 }
  0xe9   :  { %269 = vmatpush3.bf16.msra.mxu1 %v169_v46 }
  0xea   :  { %270 = vmatprep.subr.bf16.mxu1 %v284_v18 }
  0xed   :  { %271 = vmatpush3.bf16.msra.mxu1 %v168_v49 }
  0xf0   :  { %273 = vmatmul.mubr.msk.bf16.vlgmr.msra.gmra.mxu1 %vm182_vm10, %v167_v50 }
 0x1b0   :  { %v220_v56 = vpop.f32.mrf.mxu1 }
 0x1b1   :  { %v221_v57 = vadd.f32 %v220_v56, %v181_v55 }
 0x1b2   :  { %v274_v58 = vpop.f32.mrf.mxu1 }
 0x1b3   :  { %227 = vst.msk [vmem:[%s371_s5] sm:$0x1] %vm226_vm11, %v221_v57 }
 0x1b4   :  { %v223_v59 = vpop.f32.mrf.mxu1 }
 0x1b6   :  { %v275_v60 = vpop.f32.mrf.mxu1 }

</bundles_post_ra>
